<compile_context>
chip_gen: v7x
topology: tpu7x:2x2x1
jax: 0.10.0
libtpu: 0.0.40
codegen_flags: <defaults>
</compile_context>

<pallas_src>
import functools

import numpy as np
import jax
import jax.numpy as jnp
from jax.experimental import pallas as pl
from jax.experimental.pallas import tpu as pltpu


def _round_up(x, m):
    return ((x + m - 1) // m) * m


# ----------------------------------------------------------------------------
# Kernel 1: conv1 as matmul + bias + ReLU (full-K, full-N blocks, big M tile)
# ----------------------------------------------------------------------------
def _mm_bias_relu_kernel(a_ref, b_ref, bias_ref, o_ref):
    y = jnp.dot(a_ref[...], b_ref[...], preferred_element_type=jnp.float32)
    y = jnp.maximum(y + bias_ref[...], 0.0)
    o_ref[...] = y.astype(o_ref.dtype)


def matmul_bias_relu(a, b, bias, tm=1024, out_dtype=jnp.bfloat16):
    """(M,K) @ (K,N) + bias[N], fused ReLU.  K and N kept at full size (no padding)."""
    M, K = a.shape
    K2, N = b.shape
    assert K == K2
    tm = min(tm, _round_up(M, 8))
    Mp = _round_up(M, tm)
    a_p = a if Mp == M else jnp.pad(a, ((0, Mp - M), (0, 0)))
    out = pl.pallas_call(
        _mm_bias_relu_kernel,
        out_shape=jax.ShapeDtypeStruct((Mp, N), out_dtype),
        grid_spec=pltpu.PrefetchScalarGridSpec(
            num_scalar_prefetch=0,
            grid=(Mp // tm,),
            in_specs=[
                pl.BlockSpec((tm, K), lambda i: (i, 0)),
                pl.BlockSpec((K, N), lambda i: (0, 0)),
                pl.BlockSpec((1, N), lambda i: (0, 0)),
            ],
            out_specs=pl.BlockSpec((tm, N), lambda i: (i, 0)),
        ),
        compiler_params=pltpu.CompilerParams(dimension_semantics=("parallel",)),
    )(a_p.astype(jnp.float32), b.astype(jnp.float32),
      bias.reshape(1, N).astype(jnp.float32))
    if Mp != M:
        out = out[:M]
    return out


# ----------------------------------------------------------------------------
# Kernel 2: fused conv2(+ReLU) -> global-average-pool -> fc  (one image per step)
# ----------------------------------------------------------------------------
def _conv2_gap_fc_kernel(p_ref, w_ref, b_ref, fcw_ref, fcb_ref, o_ref, *, inv_hw):
    # p_ref: (HW, Cin*9) bf16, w_ref: (Cin*9, Cout) bf16  -> f32 accumulation
    y = jnp.dot(p_ref[...], w_ref[...], preferred_element_type=jnp.float32)
    y = jnp.maximum(y + b_ref[...], 0.0)                       # (HW, Cout)
    gap = jnp.sum(y, axis=0, keepdims=True) * inv_hw           # (1, Cout)  VPU reduction
    emb = jnp.dot(gap, fcw_ref[...], preferred_element_type=jnp.float32) + fcb_ref[...]
    o_ref[0] = emb                                             # (1, hid)


def conv2_gap_fc(patches, w_mat, bias, fc_w, fc_b, hw):
    """patches: (N_img*hw, Cin*9) -> per-image embedding (N_img, 1, hid)."""
    M, K = patches.shape
    Cout = w_mat.shape[1]
    hid = fc_w.shape[1]
    n_img = M // hw
    assert n_img * hw == M and hw % 8 == 0
    kernel = functools.partial(_conv2_gap_fc_kernel, inv_hw=1.0 / float(hw))
    return pl.pallas_call(
        kernel,
        out_shape=jax.ShapeDtypeStruct((n_img, 1, hid), jnp.float32),
        grid_spec=pltpu.PrefetchScalarGridSpec(
            num_scalar_prefetch=0,
            grid=(n_img,),
            in_specs=[
                pl.BlockSpec((hw, K), lambda n: (n, 0)),
                pl.BlockSpec((K, Cout), lambda n: (0, 0)),
                pl.BlockSpec((1, Cout), lambda n: (0, 0)),
                pl.BlockSpec((Cout, hid), lambda n: (0, 0)),
                pl.BlockSpec((1, hid), lambda n: (0, 0)),
            ],
            out_specs=pl.BlockSpec((1, 1, hid), lambda n: (n, 0, 0)),
        ),
        compiler_params=pltpu.CompilerParams(dimension_semantics=("parallel",)),
    )(patches.astype(jnp.bfloat16), w_mat.astype(jnp.bfloat16),
      bias.reshape(1, Cout).astype(jnp.float32),
      fc_w.astype(jnp.float32), fc_b.reshape(1, hid).astype(jnp.float32))


# ----------------------------------------------------------------------------
# Kernel 3: fused tail — gram -> Eq2to2 (15 bases, pre-contracted) -> relu ->
#           mean -> relu -> Linear(out_dim, 1).  One batch element per grid step,
#           everything stays in VMEM / vregs; no (B,D,15,m,m) blow-up.
# ----------------------------------------------------------------------------
def _tail_kernel(emb_ref, wa_ref, wr_ref, wsd_ref, wt_ref, wf_ref,
                 eqb_ref, ow_ref, ob_ref, o_ref, *, k, S):
    emb = emb_ref[0].astype(jnp.float32)                        # (k, D)

    # Reductions of the symmetric gram x[d,i,j] = emb[i,d]*emb[j,d]:
    col_tot = jnp.sum(emb, axis=0, keepdims=True)               # (1, D) sum_i emb[i,d]
    diag_kd = emb * emb                                         # (k, D) diag[d,i]
    rowsum_kd = emb * col_tot                                   # (k, D) row/col sums
    sum_diag = jnp.sum(diag_kd, axis=0, keepdims=True)          # (1, D) trace
    tot = col_tot * col_tot                                     # (1, D) total sum

    # Per-row-index terms: [diag-position | broadcast-over-j | broadcast-over-i]
    per_i = (jnp.dot(diag_kd, wa_ref[...], preferred_element_type=jnp.float32)
             + jnp.dot(rowsum_kd, wr_ref[...], preferred_element_type=jnp.float32))  # (k, 3S)
    diag_pos = per_i[:, 0:S]
    row_bc = per_i[:, S:2 * S]
    col_bc = per_i[:, 2 * S:3 * S]

    # Constant terms: [on-diagonal constant | everywhere constant]
    consts = (jnp.dot(sum_diag, wsd_ref[...], preferred_element_type=jnp.float32)
              + jnp.dot(tot, wt_ref[...], preferred_element_type=jnp.float32))       # (1, 2S)
    diag_const = consts[:, 0:S]
    const = consts[:, S:2 * S] + eqb_ref[...]

    # Full (identity / transpose) term through the gram itself.
    gram_flat = (emb[:, None, :] * emb[None, :, :]).reshape(k * k, -1)                # (k*k, D)
    full = jnp.dot(gram_flat, wf_ref[...], preferred_element_type=jnp.float32)        # (k*k, S)

    # Assemble y[i,j,s], then relu -> mean over (i,j) -> relu -> final linear.
    y = full.reshape(k, k, S)
    y = y + row_bc[:, None, :] + col_bc[None, :, :] + const[None, :, :]
    ii = jax.lax.broadcasted_iota(jnp.int32, (k, k), 0)
    jj = jax.lax.broadcasted_iota(jnp.int32, (k, k), 1)
    eye = (ii == jj).astype(jnp.float32)[:, :, None]
    y = y + eye * (diag_pos[:, None, :] + diag_const[None, :, :])

    y = jnp.maximum(y, 0.0)
    pooled = jnp.sum(y.reshape(k * k, S), axis=0, keepdims=True) * (1.0 / float(k * k))
    pooled = jnp.maximum(pooled, 0.0)                           # (1, S)

    out = jnp.sum(pooled * ow_ref[...], axis=1, keepdims=True) + ob_ref[...]          # (1, 1)
    o_ref[0] = out


def eq2_tail(emb, eq_coeffs, eq_bias, out_w, out_b):
    """emb: (B, k, D) -> (B, 1).  Pre-contracts the 15 Eq2to2 basis coefficients."""
    B, k, D = emb.shape
    S = eq_coeffs.shape[1]
    m = float(k)
    c = eq_coeffs.astype(jnp.float32)                           # (D, S, 15)
    op = lambda p: c[:, :, p]

    # ops 1..15 grouped by structure (gram is symmetric: row_sum == col_sum, x == x^T)
    w_a = jnp.concatenate([op(0), op(11), op(12)], axis=1)                      # × diag[d,i]
    w_r = jnp.concatenate([(op(2) + op(3)) / m, (op(5) + op(6)) / m,
                           (op(7) + op(8)) / m], axis=1)                        # × row_sum[d,i]/1
    w_sd = jnp.concatenate([op(1) / m, op(13) / m], axis=1)                     # × trace
    w_t = jnp.concatenate([op(4) / (m * m), op(14) / (m * m)], axis=1)          # × total
    w_f = op(9) + op(10)                                                        # × x[d,i,j]

    eqb = eq_bias.reshape(1, S).astype(jnp.float32)
    ow = out_w.reshape(1, S).astype(jnp.float32)        # (S,1) column vec -> row
    ob = out_b.reshape(1, 1).astype(jnp.float32)

    kernel = functools.partial(_tail_kernel, k=k, S=S)
    out = pl.pallas_call(
        kernel,
        out_shape=jax.ShapeDtypeStruct((B, 1, 1), jnp.float32),
        grid_spec=pltpu.PrefetchScalarGridSpec(
            num_scalar_prefetch=0,
            grid=(B,),
            in_specs=[
                pl.BlockSpec((1, k, D), lambda b: (b, 0, 0)),
                pl.BlockSpec((D, 3 * S), lambda b: (0, 0)),
                pl.BlockSpec((D, 3 * S), lambda b: (0, 0)),
                pl.BlockSpec((D, 2 * S), lambda b: (0, 0)),
                pl.BlockSpec((D, 2 * S), lambda b: (0, 0)),
                pl.BlockSpec((D, S), lambda b: (0, 0)),
                pl.BlockSpec((1, S), lambda b: (0, 0)),
                pl.BlockSpec((1, S), lambda b: (0, 0)),
                pl.BlockSpec((1, 1), lambda b: (0, 0)),
            ],
            out_specs=pl.BlockSpec((1, 1, 1), lambda b: (b, 0, 0)),
        ),
        compiler_params=pltpu.CompilerParams(dimension_semantics=("parallel",)),
    )(emb.astype(jnp.float32), w_a, w_r, w_sd, w_t, w_f, eqb, ow, ob)
    return out.reshape(B, 1)


# ----------------------------------------------------------------------------
# Glue: im2col for 3x3 "same" conv on NHWC (pure data movement; matmuls in Pallas)
# ----------------------------------------------------------------------------
def im2col_3x3_same_nhwc(x):
    """x: (N, H, W, C) -> (N*H*W, C*9) rows; patch layout: (channel, ki, kj)."""
    N, H, W, C = x.shape
    xp = jnp.pad(x, ((0, 0), (1, 1), (1, 1), (0, 0)))
    cols = [xp[:, di:di + H, dj:dj + W, :] for di in range(3) for dj in range(3)]
    p = jnp.stack(cols, axis=-1)                      # (N, H, W, C, 9)
    return p.reshape(N * H * W, C * 9)


# ----------------------------------------------------------------------------
# Full forward pass
# ----------------------------------------------------------------------------
def unique_eq2_net_forward(params, x):
    """x: (B, k, h, w) -> (B, 1), mirroring UniqueEq2Net.forward."""
    B, k, h, w = x.shape
    n_img = B * k
    hid = params["conv1_w"].shape[0]

    # BasicConvNet embed ------------------------------------------------------
    x_img = x.reshape(n_img, h, w, 1).astype(jnp.float32)        # NHWC, Cin=1
    patches1 = im2col_3x3_same_nhwc(x_img)                        # (n_img*h*w, 9)
    w1_mat = params["conv1_w"].reshape(hid, 9).T                  # (9, hid)
    feat1 = matmul_bias_relu(patches1, w1_mat, params["conv1_b"],
                             tm=1024, out_dtype=jnp.bfloat16)     # (n_img*h*w, hid)
    feat1 = feat1.reshape(n_img, h, w, hid)

    patches2 = im2col_3x3_same_nhwc(feat1)                        # (n_img*h*w, hid*9) bf16
    w2_mat = params["conv2_w"].reshape(hid, hid * 9).T            # (hid*9, hid)
    emb = conv2_gap_fc(patches2, w2_mat, params["conv2_b"],
                       params["fc_w"], params["fc_b"], hw=h * w)  # (n_img, 1, hid)
    emb = emb.reshape(B, k, hid)

    # gram -> Eq2to2 -> relu -> mean -> relu -> (dropout p=0) -> Linear(out,1) --
    return eq2_tail(emb, params["eq_coeffs"], params["eq_bias"],
                    params["out_w"], params["out_b"])             # (B, 1)


# ----------------------------------------------------------------------------
# Deterministic parameter init (shapes from the module's __init__)
# ----------------------------------------------------------------------------
def init_params(key, hid_dim, out_dim):
    ks = jax.random.split(key, 6)

    def init(k_, shape, fan_in):
        return (jax.random.normal(k_, shape, jnp.float32) / np.sqrt(fan_in)).astype(jnp.float32)

    return dict(
        conv1_w=init(ks[0], (hid_dim, 1, 3, 3), 9),
        conv1_b=jnp.zeros((hid_dim,), jnp.float32),
        conv2_w=init(ks[1], (hid_dim, hid_dim, 3, 3), hid_dim * 9),
        conv2_b=jnp.zeros((hid_dim,), jnp.float32),
        fc_w=init(ks[2], (hid_dim, hid_dim), hid_dim),
        fc_b=jnp.zeros((hid_dim,), jnp.float32),
        eq_coeffs=init(ks[3], (hid_dim, out_dim, 15), hid_dim * 15),
        eq_bias=jnp.zeros((out_dim,), jnp.float32),
        out_w=init(ks[4], (out_dim, 1), out_dim),
        out_b=jnp.zeros((1,), jnp.float32),
    )


if __name__ == "__main__":
    key = jax.random.PRNGKey(0)
    kp, kx = jax.random.split(key)

    B, k, h, w = 2, 4, 16, 16          # x: (batch, set size, height, width)
    hid_dim, out_dim = 16, 16

    params = init_params(kp, hid_dim, out_dim)
    x = jax.random.normal(kx, (B, k, h, w), dtype=jnp.float32)

    fwd = jax.jit(functools.partial(unique_eq2_net_forward, params))
    y = fwd(x)
    jax.block_until_ready(y)
    assert y.shape == (B, 1) and y.dtype == jnp.float32
    print("KERNEL_OK")
</pallas_src>

<mosaic_0001>
module attributes {stable_mosaic.version = 11 : i64} {
  func.func @_mm_bias_relu_kernel(%arg0: i32, %arg1: memref<1024x9xf32, #tpu.memory_space<vmem>>, %arg2: memref<9x16xf32, #tpu.memory_space<vmem>>, %arg3: memref<1x16xf32, #tpu.memory_space<vmem>>, %arg4: memref<1024x16xbf16, #tpu.memory_space<vmem>>) attributes {dimension_semantics = [#tpu.dimension_semantics<parallel>], iteration_bounds = array<i64: 2>, scalar_prefetch = 0 : i64, scratch_operands = 0 : i64, tpu.core_type = #tpu.core_type<tc>, window_params = [{transform_indices = @transform_0, window_bounds = array<i64: 1024, 9>}, {pipeline_mode = #tpu.pipeline_mode<synchronous>, transform_indices = @transform_1, window_bounds = array<i64: 9, 16>}, {pipeline_mode = #tpu.pipeline_mode<synchronous>, transform_indices = @transform_2, window_bounds = array<i64: 1, 16>}, {transform_indices = @transform_3, window_bounds = array<i64: 1024, 16>}]} {
    %c0 = arith.constant 0 : index
    %c0_0 = arith.constant 0 : index
    %0 = vector.load %arg1[%c0, %c0_0] : memref<1024x9xf32, #tpu.memory_space<vmem>>, vector<1024x9xf32>
    %c0_1 = arith.constant 0 : index
    %c0_2 = arith.constant 0 : index
    %1 = vector.load %arg2[%c0_1, %c0_2] : memref<9x16xf32, #tpu.memory_space<vmem>>, vector<9x16xf32>
    %cst = arith.constant dense<0.000000e+00> : vector<1024x16xf32>
    %2 = tpu.matmul %0, %1, %cst {dimension_numbers = #tpu.dot_dimension_numbers<[1], [0], [0], [1], [0, 0, 1, 1], [], []>} : vector<1024x9xf32>, vector<9x16xf32>, vector<1024x16xf32> -> vector<1024x16xf32>
    %c0_3 = arith.constant 0 : index
    %c0_4 = arith.constant 0 : index
    %3 = vector.load %arg3[%c0_3, %c0_4] : memref<1x16xf32, #tpu.memory_space<vmem>>, vector<1x16xf32>
    %4 = vector.broadcast %3 : vector<1x16xf32> to vector<1024x16xf32>
    %5 = arith.addf %2, %4 : vector<1024x16xf32>
    %cst_5 = arith.constant 0.000000e+00 : f32
    %6 = vector.broadcast %cst_5 : f32 to vector<1024x16xf32>
    %7 = arith.maximumf %5, %6 : vector<1024x16xf32>
    %8 = arith.truncf %7 : vector<1024x16xf32> to vector<1024x16xbf16>
    %c0_6 = arith.constant 0 : index
    %c0_7 = arith.constant 0 : index
    %9 = vector.load %arg4[%c0_6, %c0_7] : memref<1024x16xbf16, #tpu.memory_space<vmem>>, vector<1024x16xbf16>
    tpu.vector_store %arg4[%c0_6, %c0_7], %8 {strides = array<i32>} : memref<1024x16xbf16, #tpu.memory_space<vmem>>, vector<1024x16xbf16>,
    return
  }
  func.func @transform_0(%arg0: i32) -> (i32, i32) {
    %c0_i32 = arith.constant 0 : i32
    %c0_i32_0 = arith.constant 0 : i32
    return %arg0, %c0_i32 : i32, i32
  }
  func.func @transform_1(%arg0: i32) -> (i32, i32) {
    %c0_i32 = arith.constant 0 : i32
    %c0_i32_0 = arith.constant 0 : i32
    %c0_i32_1 = arith.constant 0 : i32
    return %c0_i32, %c0_i32_0 : i32, i32
  }
  func.func @transform_2(%arg0: i32) -> (i32, i32) {
    %c0_i32 = arith.constant 0 : i32
    %c0_i32_0 = arith.constant 0 : i32
    %c0_i32_1 = arith.constant 0 : i32
    return %c0_i32, %c0_i32_0 : i32, i32
  }
  func.func @transform_3(%arg0: i32) -> (i32, i32) {
    %c0_i32 = arith.constant 0 : i32
    %c0_i32_0 = arith.constant 0 : i32
    return %arg0, %c0_i32 : i32, i32
  }
}

module attributes {stable_mosaic.version = 11 : i64} {
  func.func @_conv2_gap_fc_kernel(%arg0: i32, %arg1: memref<256x144xbf16, #tpu.memory_space<vmem>>, %arg2: memref<144x16xbf16, #tpu.memory_space<vmem>>, %arg3: memref<1x16xf32, #tpu.memory_space<vmem>>, %arg4: memref<16x16xf32, #tpu.memory_space<vmem>>, %arg5: memref<1x16xf32, #tpu.memory_space<vmem>>, %arg6: memref<1x1x16xf32, #tpu.memory_space<vmem>>) attributes {dimension_semantics = [#tpu.dimension_semantics<parallel>], iteration_bounds = array<i64: 8>, scalar_prefetch = 0 : i64, scratch_operands = 0 : i64, tpu.core_type = #tpu.core_type<tc>, window_params = [{transform_indices = @transform_0, window_bounds = array<i64: 256, 144>}, {pipeline_mode = #tpu.pipeline_mode<synchronous>, transform_indices = @transform_1, window_bounds = array<i64: 144, 16>}, {pipeline_mode = #tpu.pipeline_mode<synchronous>, transform_indices = @transform_2, window_bounds = array<i64: 1, 16>}, {pipeline_mode = #tpu.pipeline_mode<synchronous>, transform_indices = @transform_3, window_bounds = array<i64: 16, 16>}, {pipeline_mode = #tpu.pipeline_mode<synchronous>, transform_indices = @transform_4, window_bounds = array<i64: 1, 16>}, {transform_indices = @transform_5, window_bounds = array<i64: 1, 1, 16>}]} {
    %c0 = arith.constant 0 : index
    %c0_0 = arith.constant 0 : index
    %0 = vector.load %arg1[%c0, %c0_0] : memref<256x144xbf16, #tpu.memory_space<vmem>>, vector<256x144xbf16>
    %c0_1 = arith.constant 0 : index
    %c0_2 = arith.constant 0 : index
    %1 = vector.load %arg2[%c0_1, %c0_2] : memref<144x16xbf16, #tpu.memory_space<vmem>>, vector<144x16xbf16>
    %cst = arith.constant dense<0.000000e+00> : vector<256x16xf32>
    %2 = tpu.matmul %0, %1, %cst {dimension_numbers = #tpu.dot_dimension_numbers<[1], [0], [0], [1], [0, 0, 1, 1], [], []>} : vector<256x144xbf16>, vector<144x16xbf16>, vector<256x16xf32> -> vector<256x16xf32>
    %c0_3 = arith.constant 0 : index
    %c0_4 = arith.constant 0 : index
    %3 = vector.load %arg3[%c0_3, %c0_4] : memref<1x16xf32, #tpu.memory_space<vmem>>, vector<1x16xf32>
    %4 = vector.broadcast %3 : vector<1x16xf32> to vector<256x16xf32>
    %5 = arith.addf %2, %4 : vector<256x16xf32>
    %cst_5 = arith.constant 0.000000e+00 : f32
    %6 = vector.broadcast %cst_5 : f32 to vector<256x16xf32>
    %7 = arith.maximumf %5, %6 : vector<256x16xf32>
    %cst_6 = arith.constant dense<0.000000e+00> : vector<16xf32>
    %8 = vector.multi_reduction <add>, %7, %cst_6 [0] : vector<256x16xf32> to vector<16xf32>
    %9 = vector.shape_cast %8 : vector<16xf32> to vector<1x16xf32>
    %cst_7 = arith.constant 3.906250e-03 : f32
    %10 = vector.broadcast %cst_7 : f32 to vector<1x16xf32>
    %11 = arith.mulf %9, %10 : vector<1x16xf32>
    %c0_8 = arith.constant 0 : index
    %c0_9 = arith.constant 0 : index
    %12 = vector.load %arg4[%c0_8, %c0_9] : memref<16x16xf32, #tpu.memory_space<vmem>>, vector<16x16xf32>
    %cst_10 = arith.constant dense<0.000000e+00> : vector<1x16xf32>
    %13 = tpu.matmul %11, %12, %cst_10 {dimension_numbers = #tpu.dot_dimension_numbers<[1], [0], [0], [1], [0, 0, 1, 1], [], []>} : vector<1x16xf32>, vector<16x16xf32>, vector<1x16xf32> -> vector<1x16xf32>
    %c0_11 = arith.constant 0 : index
    %c0_12 = arith.constant 0 : index
    %14 = vector.load %arg5[%c0_11, %c0_12] : memref<1x16xf32, #tpu.memory_space<vmem>>, vector<1x16xf32>
    %15 = arith.addf %13, %14 : vector<1x16xf32>
    %c0_13 = arith.constant 0 : index
    %c0_14 = arith.constant 0 : index
    %c0_15 = arith.constant 0 : index
    %16 = vector.load %arg6[%c0_13, %c0_14, %c0_15] : memref<1x1x16xf32, #tpu.memory_space<vmem>>, vector<1x1x16xf32>
    %17 = vector.shape_cast %16 : vector<1x1x16xf32> to vector<1x16xf32>
    %18 = vector.shape_cast %15 : vector<1x16xf32> to vector<1x1x16xf32>
    tpu.vector_store %arg6[%c0_13, %c0_14, %c0_15], %18 {strides = array<i32>} : memref<1x1x16xf32, #tpu.memory_space<vmem>>, vector<1x1x16xf32>,
    return
  }
  func.func @transform_0(%arg0: i32) -> (i32, i32) {
    %c0_i32 = arith.constant 0 : i32
    %c0_i32_0 = arith.constant 0 : i32
    return %arg0, %c0_i32 : i32, i32
  }
  func.func @transform_1(%arg0: i32) -> (i32, i32) {
    %c0_i32 = arith.constant 0 : i32
    %c0_i32_0 = arith.constant 0 : i32
    %c0_i32_1 = arith.constant 0 : i32
    return %c0_i32, %c0_i32_0 : i32, i32
  }
  func.func @transform_2(%arg0: i32) -> (i32, i32) {
    %c0_i32 = arith.constant 0 : i32
    %c0_i32_0 = arith.constant 0 : i32
    %c0_i32_1 = arith.constant 0 : i32
    return %c0_i32, %c0_i32_0 : i32, i32
  }
  func.func @transform_3(%arg0: i32) -> (i32, i32) {
    %c0_i32 = arith.constant 0 : i32
    %c0_i32_0 = arith.constant 0 : i32
    %c0_i32_1 = arith.constant 0 : i32
    return %c0_i32, %c0_i32_0 : i32, i32
  }
  func.func @transform_4(%arg0: i32) -> (i32, i32) {
    %c0_i32 = arith.constant 0 : i32
    %c0_i32_0 = arith.constant 0 : i32
    %c0_i32_1 = arith.constant 0 : i32
    return %c0_i32, %c0_i32_0 : i32, i32
  }
  func.func @transform_5(%arg0: i32) -> (i32, i32, i32) {
    %c0_i32 = arith.constant 0 : i32
    %c0_i32_0 = arith.constant 0 : i32
    %c0_i32_1 = arith.constant 0 : i32
    return %arg0, %c0_i32, %c0_i32_0 : i32, i32, i32
  }
}

module attributes {stable_mosaic.version = 11 : i64} {
  func.func @_tail_kernel(%arg0: i32, %arg1: memref<1x4x16xf32, #tpu.memory_space<vmem>>, %arg2: memref<16x48xf32, #tpu.memory_space<vmem>>, %arg3: memref<16x48xf32, #tpu.memory_space<vmem>>, %arg4: memref<16x32xf32, #tpu.memory_space<vmem>>, %arg5: memref<16x32xf32, #tpu.memory_space<vmem>>, %arg6: memref<16x16xf32, #tpu.memory_space<vmem>>, %arg7: memref<1x16xf32, #tpu.memory_space<vmem>>, %arg8: memref<1x16xf32, #tpu.memory_space<vmem>>, %arg9: memref<1x1xf32, #tpu.memory_space<vmem>>, %arg10: memref<1x1x1xf32, #tpu.memory_space<vmem>>) attributes {dimension_semantics = [#tpu.dimension_semantics<parallel>], iteration_bounds = array<i64: 2>, scalar_prefetch = 0 : i64, scratch_operands = 0 : i64, tpu.core_type = #tpu.core_type<tc>, window_params = [{transform_indices = @transform_0, window_bounds = array<i64: 1, 4, 16>}, {pipeline_mode = #tpu.pipeline_mode<synchronous>, transform_indices = @transform_1, window_bounds = array<i64: 16, 48>}, {pipeline_mode = #tpu.pipeline_mode<synchronous>, transform_indices = @transform_2, window_bounds = array<i64: 16, 48>}, {pipeline_mode = #tpu.pipeline_mode<synchronous>, transform_indices = @transform_3, window_bounds = array<i64: 16, 32>}, {pipeline_mode = #tpu.pipeline_mode<synchronous>, transform_indices = @transform_4, window_bounds = array<i64: 16, 32>}, {pipeline_mode = #tpu.pipeline_mode<synchronous>, transform_indices = @transform_5, window_bounds = array<i64: 16, 16>}, {pipeline_mode = #tpu.pipeline_mode<synchronous>, transform_indices = @transform_6, window_bounds = array<i64: 1, 16>}, {pipeline_mode = #tpu.pipeline_mode<synchronous>, transform_indices = @transform_7, window_bounds = array<i64: 1, 16>}, {pipeline_mode = #tpu.pipeline_mode<synchronous>, transform_indices = @transform_8, window_bounds = array<i64: 1, 1>}, {transform_indices = @transform_9, window_bounds = array<i64: 1, 1, 1>}]} {
    %c0 = arith.constant 0 : index
    %c0_0 = arith.constant 0 : index
    %c0_1 = arith.constant 0 : index
    %0 = vector.load %arg1[%c0, %c0_0, %c0_1] : memref<1x4x16xf32, #tpu.memory_space<vmem>>, vector<1x4x16xf32>
    %1 = vector.shape_cast %0 : vector<1x4x16xf32> to vector<4x16xf32>
    %cst = arith.constant dense<0.000000e+00> : vector<16xf32>
    %2 = vector.multi_reduction <add>, %1, %cst [0] : vector<4x16xf32> to vector<16xf32>
    %3 = vector.shape_cast %2 : vector<16xf32> to vector<1x16xf32>
    %4 = arith.mulf %1, %1 : vector<4x16xf32>
    %5 = vector.broadcast %3 : vector<1x16xf32> to vector<4x16xf32>
    %6 = arith.mulf %1, %5 : vector<4x16xf32>
    %cst_2 = arith.constant dense<0.000000e+00> : vector<16xf32>
    %7 = vector.multi_reduction <add>, %4, %cst_2 [0] : vector<4x16xf32> to vector<16xf32>
    %8 = vector.shape_cast %7 : vector<16xf32> to vector<1x16xf32>
    %9 = arith.mulf %3, %3 : vector<1x16xf32>
    %c0_3 = arith.constant 0 : index
    %c0_4 = arith.constant 0 : index
    %10 = vector.load %arg2[%c0_3, %c0_4] : memref<16x48xf32, #tpu.memory_space<vmem>>, vector<16x48xf32>
    %cst_5 = arith.constant dense<0.000000e+00> : vector<4x48xf32>
    %11 = tpu.matmul %4, %10, %cst_5 {dimension_numbers = #tpu.dot_dimension_numbers<[1], [0], [0], [1], [0, 0, 1, 1], [], []>} : vector<4x16xf32>, vector<16x48xf32>, vector<4x48xf32> -> vector<4x48xf32>
    %c0_6 = arith.constant 0 : index
    %c0_7 = arith.constant 0 : index
    %12 = vector.load %arg3[%c0_6, %c0_7] : memref<16x48xf32, #tpu.memory_space<vmem>>, vector<16x48xf32>
    %cst_8 = arith.constant dense<0.000000e+00> : vector<4x48xf32>
    %13 = tpu.matmul %6, %12, %cst_8 {dimension_numbers = #tpu.dot_dimension_numbers<[1], [0], [0], [1], [0, 0, 1, 1], [], []>} : vector<4x16xf32>, vector<16x48xf32>, vector<4x48xf32> -> vector<4x48xf32>
    %14 = arith.addf %11, %13 : vector<4x48xf32>
    %15 = vector.extract_strided_slice %14 {offsets = [0, 0], sizes = [4, 16], strides = [1, 1]} : vector<4x48xf32> to vector<4x16xf32>
    %16 = vector.extract_strided_slice %14 {offsets = [0, 16], sizes = [4, 16], strides = [1, 1]} : vector<4x48xf32> to vector<4x16xf32>
    %17 = vector.extract_strided_slice %14 {offsets = [0, 32], sizes = [4, 16], strides = [1, 1]} : vector<4x48xf32> to vector<4x16xf32>
    %c0_9 = arith.constant 0 : index
    %c0_10 = arith.constant 0 : index
    %18 = vector.load %arg4[%c0_9, %c0_10] : memref<16x32xf32, #tpu.memory_space<vmem>>, vector<16x32xf32>
    %cst_11 = arith.constant dense<0.000000e+00> : vector<1x32xf32>
    %19 = tpu.matmul %8, %18, %cst_11 {dimension_numbers = #tpu.dot_dimension_numbers<[1], [0], [0], [1], [0, 0, 1, 1], [], []>} : vector<1x16xf32>, vector<16x32xf32>, vector<1x32xf32> -> vector<1x32xf32>
    %c0_12 = arith.constant 0 : index
    %c0_13 = arith.constant 0 : index
    %20 = vector.load %arg5[%c0_12, %c0_13] : memref<16x32xf32, #tpu.memory_space<vmem>>, vector<16x32xf32>
    %cst_14 = arith.constant dense<0.000000e+00> : vector<1x32xf32>
    %21 = tpu.matmul %9, %20, %cst_14 {dimension_numbers = #tpu.dot_dimension_numbers<[1], [0], [0], [1], [0, 0, 1, 1], [], []>} : vector<1x16xf32>, vector<16x32xf32>, vector<1x32xf32> -> vector<1x32xf32>
    %22 = arith.addf %19, %21 : vector<1x32xf32>
    %23 = vector.extract_strided_slice %22 {offsets = [0, 0], sizes = [1, 16], strides = [1, 1]} : vector<1x32xf32> to vector<1x16xf32>
    %24 = vector.extract_strided_slice %22 {offsets = [0, 16], sizes = [1, 16], strides = [1, 1]} : vector<1x32xf32> to vector<1x16xf32>
    %c0_15 = arith.constant 0 : index
    %c0_16 = arith.constant 0 : index
    %25 = vector.load %arg7[%c0_15, %c0_16] : memref<1x16xf32, #tpu.memory_space<vmem>>, vector<1x16xf32>
    %26 = arith.addf %24, %25 : vector<1x16xf32>
    %27 = vector.shape_cast %1 : vector<4x16xf32> to vector<4x1x16xf32>
    %28 = vector.shape_cast %1 : vector<4x16xf32> to vector<1x4x16xf32>
    %29 = vector.broadcast %27 : vector<4x1x16xf32> to vector<4x4x16xf32>
    %30 = vector.broadcast %28 : vector<1x4x16xf32> to vector<4x4x16xf32>
    %31 = arith.mulf %29, %30 : vector<4x4x16xf32>
    %32 = vector.shape_cast %31 : vector<4x4x16xf32> to vector<16x16xf32>
    %c0_17 = arith.constant 0 : index
    %c0_18 = arith.constant 0 : index
    %33 = vector.load %arg6[%c0_17, %c0_18] : memref<16x16xf32, #tpu.memory_space<vmem>>, vector<16x16xf32>
    %cst_19 = arith.constant dense<0.000000e+00> : vector<16x16xf32>
    %34 = tpu.matmul %32, %33, %cst_19 {dimension_numbers = #tpu.dot_dimension_numbers<[1], [0], [0], [1], [0, 0, 1, 1], [], []>} : vector<16x16xf32>, vector<16x16xf32>, vector<16x16xf32> -> vector<16x16xf32>
    %35 = vector.shape_cast %34 : vector<16x16xf32> to vector<4x4x16xf32>
    %36 = vector.shape_cast %16 : vector<4x16xf32> to vector<4x1x16xf32>
    %37 = vector.broadcast %36 : vector<4x1x16xf32> to vector<4x4x16xf32>
    %38 = arith.addf %35, %37 : vector<4x4x16xf32>
    %39 = vector.shape_cast %17 : vector<4x16xf32> to vector<1x4x16xf32>
    %40 = vector.broadcast %39 : vector<1x4x16xf32> to vector<4x4x16xf32>
    %41 = arith.addf %38, %40 : vector<4x4x16xf32>
    %42 = vector.shape_cast %26 : vector<1x16xf32> to vector<1x1x16xf32>
    %43 = vector.broadcast %42 : vector<1x1x16xf32> to vector<4x4x16xf32>
    %44 = arith.addf %41, %43 : vector<4x4x16xf32>
    %45 = tpu.iota {dimensions = array<i32: 0>} : vector<4x4xi32>
    %46 = tpu.iota {dimensions = array<i32: 1>} : vector<4x4xi32>
    %47 = arith.cmpi eq, %45, %46 : vector<4x4xi32>
    %48 = arith.extui %47 : vector<4x4xi1> to vector<4x4xi32>
    %49 = arith.sitofp %48 : vector<4x4xi32> to vector<4x4xf32>
    %50 = vector.shape_cast %49 : vector<4x4xf32> to vector<4x4x1xf32>
    %51 = vector.shape_cast %15 : vector<4x16xf32> to vector<4x1x16xf32>
    %52 = vector.shape_cast %23 : vector<1x16xf32> to vector<1x1x16xf32>
    %53 = vector.broadcast %52 : vector<1x1x16xf32> to vector<4x1x16xf32>
    %54 = arith.addf %51, %53 : vector<4x1x16xf32>
    %55 = vector.broadcast %50 : vector<4x4x1xf32> to vector<4x4x16xf32>
    %56 = vector.broadcast %54 : vector<4x1x16xf32> to vector<4x4x16xf32>
    %57 = arith.mulf %55, %56 : vector<4x4x16xf32>
    %58 = arith.addf %44, %57 : vector<4x4x16xf32>
    %cst_20 = arith.constant 0.000000e+00 : f32
    %59 = vector.broadcast %cst_20 : f32 to vector<4x4x16xf32>
    %60 = arith.maximumf %58, %59 : vector<4x4x16xf32>
    %61 = vector.shape_cast %60 : vector<4x4x16xf32> to vector<16x16xf32>
    %cst_21 = arith.constant dense<0.000000e+00> : vector<16xf32>
    %62 = vector.multi_reduction <add>, %61, %cst_21 [0] : vector<16x16xf32> to vector<16xf32>
    %63 = vector.shape_cast %62 : vector<16xf32> to vector<1x16xf32>
    %cst_22 = arith.constant 6.250000e-02 : f32
    %64 = vector.broadcast %cst_22 : f32 to vector<1x16xf32>
    %65 = arith.mulf %63, %64 : vector<1x16xf32>
    %cst_23 = arith.constant 0.000000e+00 : f32
    %66 = vector.broadcast %cst_23 : f32 to vector<1x16xf32>
    %67 = arith.maximumf %65, %66 : vector<1x16xf32>
    %c0_24 = arith.constant 0 : index
    %c0_25 = arith.constant 0 : index
    %68 = vector.load %arg8[%c0_24, %c0_25] : memref<1x16xf32, #tpu.memory_space<vmem>>, vector<1x16xf32>
    %69 = arith.mulf %67, %68 : vector<1x16xf32>
    %cst_26 = arith.constant dense<0.000000e+00> : vector<1xf32>
    %70 = vector.multi_reduction <add>, %69, %cst_26 [1] : vector<1x16xf32> to vector<1xf32>
    %71 = vector.shape_cast %70 : vector<1xf32> to vector<1x1xf32>
    %c0_27 = arith.constant 0 : index
    %c0_28 = arith.constant 0 : index
    %72 = vector.load %arg9[%c0_27, %c0_28] : memref<1x1xf32, #tpu.memory_space<vmem>>, vector<1x1xf32>
    %73 = arith.addf %71, %72 : vector<1x1xf32>
    %c0_29 = arith.constant 0 : index
    %c0_30 = arith.constant 0 : index
    %c0_31 = arith.constant 0 : index
    %74 = vector.load %arg10[%c0_29, %c0_30, %c0_31] : memref<1x1x1xf32, #tpu.memory_space<vmem>>, vector<1x1x1xf32>
    %75 = vector.shape_cast %74 : vector<1x1x1xf32> to vector<1x1xf32>
    %76 = vector.shape_cast %73 : vector<1x1xf32> to vector<1x1x1xf32>
    tpu.vector_store %arg10[%c0_29, %c0_30, %c0_31], %76 {strides = array<i32>} : memref<1x1x1xf32, #tpu.memory_space<vmem>>, vector<1x1x1xf32>,
    return
  }
  func.func @transform_0(%arg0: i32) -> (i32, i32, i32) {
    %c0_i32 = arith.constant 0 : i32
    %c0_i32_0 = arith.constant 0 : i32
    %c0_i32_1 = arith.constant 0 : i32
    return %arg0, %c0_i32, %c0_i32_0 : i32, i32, i32
  }
  func.func @transform_1(%arg0: i32) -> (i32, i32) {
    %c0_i32 = arith.constant 0 : i32
    %c0_i32_0 = arith.constant 0 : i32
    %c0_i32_1 = arith.constant 0 : i32
    return %c0_i32, %c0_i32_0 : i32, i32
  }
  func.func @transform_2(%arg0: i32) -> (i32, i32) {
    %c0_i32 = arith.constant 0 : i32
    %c0_i32_0 = arith.constant 0 : i32
    %c0_i32_1 = arith.constant 0 : i32
    return %c0_i32, %c0_i32_0 : i32, i32
  }
  func.func @transform_3(%arg0: i32) -> (i32, i32) {
    %c0_i32 = arith.constant 0 : i32
    %c0_i32_0 = arith.constant 0 : i32
    %c0_i32_1 = arith.constant 0 : i32
    return %c0_i32, %c0_i32_0 : i32, i32
  }
  func.func @transform_4(%arg0: i32) -> (i32, i32) {
    %c0_i32 = arith.constant 0 : i32
    %c0_i32_0 = arith.constant 0 : i32
    %c0_i32_1 = arith.constant 0 : i32
    return %c0_i32, %c0_i32_0 : i32, i32
  }
  func.func @transform_5(%arg0: i32) -> (i32, i32) {
    %c0_i32 = arith.constant 0 : i32
    %c0_i32_0 = arith.constant 0 : i32
    %c0_i32_1 = arith.constant 0 : i32
    return %c0_i32, %c0_i32_0 : i32, i32
  }
  func.func @transform_6(%arg0: i32) -> (i32, i32) {
    %c0_i32 = arith.constant 0 : i32
    %c0_i32_0 = arith.constant 0 : i32
    %c0_i32_1 = arith.constant 0 : i32
    return %c0_i32, %c0_i32_0 : i32, i32
  }
  func.func @transform_7(%arg0: i32) -> (i32, i32) {
    %c0_i32 = arith.constant 0 : i32
    %c0_i32_0 = arith.constant 0 : i32
    %c0_i32_1 = arith.constant 0 : i32
    return %c0_i32, %c0_i32_0 : i32, i32
  }
  func.func @transform_8(%arg0: i32) -> (i32, i32) {
    %c0_i32 = arith.constant 0 : i32
    %c0_i32_0 = arith.constant 0 : i32
    %c0_i32_1 = arith.constant 0 : i32
    return %c0_i32, %c0_i32_0 : i32, i32
  }
  func.func @transform_9(%arg0: i32) -> (i32, i32, i32) {
    %c0_i32 = arith.constant 0 : i32
    %c0_i32_0 = arith.constant 0 : i32
    %c0_i32_1 = arith.constant 0 : i32
    return %arg0, %c0_i32, %c0_i32_0 : i32, i32, i32
  }
}

</mosaic_0001>

<bundles_post_ra>
// kernel: unique_eq2_net_forward.3
= control target key start
LH: loop header
LB: loop body
LE: loop exit
PB: predicated region body
PF: predicated region fallthrough
CT: control target
= control target key end

     0   :  { %8 = vsyncpa [#allocation3], 0  ;;  %s3077_s12 = smov 0   ;;  %s3794_s0 = inlined_call_operand.vmem [shape: f32[2048,9], index: 0, kind: input, shape index: {}]   ;;  %s3795_s1 = inlined_call_operand.hbm [shape: f32[9,16], index: 1, kind: input, shape index: {}]   ;;  %s3796_s2 = inlined_call_operand.vmem [shape: f32[1,16], index: 2, kind: input, shape index: {}]   ;;  %s3797_s3 = inlined_call_operand.vmem [shape: bf16[2048,16], index: 3, kind: output, shape index: {}]  }
   0x1 LB: > { %s2257_s13 = sadd.s32 4294967295, %s3051_s12   ;;  %p2259_p0 = scmp.ge.s32.totalorder %s3051_s12, 1  ;;  %s3051_s12 = sphi %s3077_s12, %s14_s12  }
   0x2   : > { %p113_p1 = scmp.lt.s32.totalorder %s3051_s12, 3  ;;  %s3053_s14 = smov [#allocation2]  }
   0x3   : > { %s125_s15 = sshll.u32 %s3053_s14, 4  ;;  %p3091_p3 = scmp.eq.s32.totalorder %s2257_s13, 0  ;;  %s126_s15 = int_to_ptr.vmem [resolvable:$true] %s125_s15 }
   0x4   : > { %p3085_p2 = pnand %p2259_p0, %p113_p1  ;;  %s3013_s21 = scalar_lea.hbm %s3795_s1, 256 }
   0x5   : > { %s3802_s17 = scalar_select %p3091_p3, 1, 0 }
   0x6   : > { %s3801_s16 = scalar_select %p3085_p2, 1, 0 }
   0x7   : > { %p2994_p4 = pneg %p3085_p2  ;;  %p3014_p6 = scmp.ne.s32.totalorder %s3795_s1, %s3013_s21 }
   0x8   : > { %p3020_p10 = scmp.lt.u32.totalorder %s3013_s21, %s3795_s1 }
   0x9   : > { %p3099_p5 = pnand %p3091_p3, %p2994_p4 }
   0xb   : > { %p3015_p7 = pneg %p3099_p5 }
   0xd   : > { %p3016_p8 = pnand %p3015_p7, %p3014_p6 }
   0xf   : > { %p3017_p9 = pneg %p3016_p8 }
  0x11   : > { %p3022_p11 = pnand %p3020_p10, %p3017_p9 }
  0x13   : > { %3025 = shalt.err (!%p3022_p11)
}
  0x14   : > { %s3026_s26 = scalar_lea.vmem %s126_s15, 256  ;;  %p3034_p1 = scmp.lt.s32.totalorder %s126_s15, %s126_s15 }
  0x15   : > { %p3027_p12 = scmp.ne.s32.totalorder %s126_s15, %s3026_s26  ;;  %p3035_p4 = scmp.lt.s32.totalorder %s3026_s26, %s3026_s26 }
  0x17   : > { %p3029_p13 = pnand %p3027_p12, %p3015_p7  ;;  %p3036_p3 = por %p3035_p4, %p3034_p1 }
  0x19   : > { %p3030_p0 = pneg %p3029_p13 }
  0x1b   : > { %p3037_p2 = pnand %p3036_p3, %p3030_p0 }
  0x1d   : > { %3040 = shalt.err (!%p3037_p2)
}
  0x1e   : > { %s3054_s27 = smov 128   ;;  %s3055_s28 = smov 8  }
  0x1f   : > { %2997 = dma.hbm_to_vmem [thread:$0]  (!%p3099_p5), %s3795_s1, 256, %s126_s15, [#allocation3], %s3054_s27, %s3054_s27, %s3055_s28  }
  0x20   : > { %p3804_p6 = scmp.ne.s32.totalorder %s3801_s16, 0 }
  0x21   : > { %p3805_p8 = scmp.ne.s32.totalorder (!%p3804_p6), %s3802_s17, 0 }
  0x22   : > { %153 = sbr.rel (%p3804_p6) target bundleno = 395 (0x18b), region = 32 }
  0x29   : > { %3046 = dma.done.wait (%p3805_p8), [#allocation3], 256  }
  0x2a   : > { %3048 = vsyncadd (%p3805_p8), [#allocation3], 4294967040  ;;  %s2264_s4 = sshll.u32 %s2257_s13, 7  ;;  %vm711_vm0 = vcmask 1040384   ;;  %vm326_vm1 = vcmask 72704   ;;  %vm3056_vm2 = vmmov 1  }
  0x2b   : > { %p178_p2 = scmp.lt.s32.totalorder %s2264_s4, 255  ;;  %vm2983_vm3 = vmpackc.low %vm711_vm0, %vm3056_vm2  ;;  %v317_v0 = vld [vmem:[#allocation2] sm:$0xff]  ;;  %v318_v1 = vld [vmem:[#allocation2 + $0x8] sm:$0x1]  ;;  %vm2060_vm4 = vcmask 125952  }
  0x2c   : > { %v2982_v3 = vpack.c.bf16 %v318_v1, %v317_v0 }
  0x2d   : > { %s3807_s4 = smov (!%p178_p2, %s2264_s4), 255 }
  0x2e   : > { %s2265_s5 = sshll.u32 %s3807_s4, 3  ;;  %2984 = vmatprep.subr.msk.bf16.mxu0 %vm2983_vm3, %v2982_v3  ;;  %2988 = vmatprep.subr.msk.bf16.mxu1 %vm2983_vm3, %v2982_v3  ;;  %s2267_s11 = sshll.u32 %s3807_s4, 2 }
  0x2f   : > { %s3133_s8 = scalar_lea.vmem %s3794_s0, %s2265_s5  ;;  %2987 = vmatpush3.bf16.msk.msra.mxu0 %vm2983_vm3, %v2982_v3  ;;  %2989 = vmatpush3.bf16.msk.msra.mxu1 %vm2983_vm3, %v2982_v3  ;;  %s3404_s15 = scalar_lea.vmem %s3797_s3, %s2267_s11 }
  0x30   : > { %v189_v2 = vld [vmem:[%s3133_s8] sm:$0xff]  ;;  %v190_v5 = vld [vmem:[%s3133_s8 + $0x8] sm:$0xff]  ;;  %v191_v7 = vld [vmem:[%s3133_s8 + $0x10] sm:$0xff] }
  0x31   : > { %2790 = vmatprep.mubr.msk.f32.mxu0 %vm326_vm1, %v189_v2  ;;  %v253_v4 = vld [vmem:[%s3133_s8 + $0x200] sm:$0xff]  ;;  %v254_v6 = vld [vmem:[%s3133_s8 + $0x208] sm:$0xff]  ;;  %v255_v8 = vld [vmem:[%s3133_s8 + $0x210] sm:$0xff] }
  0x32   : > { %2886 = vmatprep.mubr.msk.f32.mxu1 %vm326_vm1, %v253_v4  ;;  %2791 = vmatmul.mubr.msk.f32.vlgmr.msra.gmra.mrb[0].mxu0 %vm326_vm1, %v190_v5  ;;  %v192_v9 = vld [vmem:[%s3133_s8 + $0x18] sm:$0xff]  ;;  %v193_v11 = vld [vmem:[%s3133_s8 + $0x20] sm:$0xff]  ;;  %v194_v13 = vld [vmem:[%s3133_s8 + $0x28] sm:$0xff] }
  0x33   : > { %2887 = vmatmul.mubr.msk.f32.vlgmr.msra.gmra.mrb[0].mxu1 %vm326_vm1, %v254_v6  ;;  %2793 = vmatprep.mubr.msk.f32.mxu0 %vm326_vm1, %v191_v7  ;;  %v256_v10 = vld [vmem:[%s3133_s8 + $0x218] sm:$0xff]  ;;  %v257_v12 = vld [vmem:[%s3133_s8 + $0x220] sm:$0xff]  ;;  %v258_v14 = vld [vmem:[%s3133_s8 + $0x228] sm:$0xff] }
  0x34   : > { %2889 = vmatprep.mubr.msk.f32.mxu1 %vm326_vm1, %v255_v8  ;;  %v195_v15 = vld [vmem:[%s3133_s8 + $0x30] sm:$0xff]  ;;  %v196_v17 = vld [vmem:[%s3133_s8 + $0x38] sm:$0xff]  ;;  %v197_v19 = vld [vmem:[%s3133_s8 + $0x40] sm:$0xff] }
  0x35   : > { %v259_v16 = vld [vmem:[%s3133_s8 + $0x230] sm:$0xff]  ;;  %v260_v18 = vld [vmem:[%s3133_s8 + $0x238] sm:$0xff]  ;;  %v261_v20 = vld [vmem:[%s3133_s8 + $0x240] sm:$0xff] }
  0x36   : > { %2794 = vmatmul.mubr.msk.f32.gmra.mrb[2].mxu0 %vm326_vm1, %v192_v9  ;;  %v198_v21 = vld [vmem:[%s3133_s8 + $0x48] sm:$0xff]  ;;  %v199_v23 = vld [vmem:[%s3133_s8 + $0x50] sm:$0xff]  ;;  %v200_v25 = vld [vmem:[%s3133_s8 + $0x58] sm:$0xff] }
  0x37   : > { %2890 = vmatmul.mubr.msk.f32.gmra.mrb[2].mxu1 %vm326_vm1, %v256_v10  ;;  %2796 = vmatprep.mubr.msk.f32.mxu0 %vm326_vm1, %v193_v11  ;;  %v262_v22 = vld [vmem:[%s3133_s8 + $0x248] sm:$0xff]  ;;  %v263_v24 = vld [vmem:[%s3133_s8 + $0x250] sm:$0xff]  ;;  %v264_v26 = vld [vmem:[%s3133_s8 + $0x258] sm:$0xff] }
  0x38   : > { %2892 = vmatprep.mubr.msk.f32.mxu1 %vm326_vm1, %v257_v12  ;;  %v201_v27 = vld [vmem:[%s3133_s8 + $0x60] sm:$0xff]  ;;  %v202_v29 = vld [vmem:[%s3133_s8 + $0x68] sm:$0xff]  ;;  %v203_v31 = vld [vmem:[%s3133_s8 + $0x70] sm:$0xff] }
  0x39   : > { %v265_v28 = vld [vmem:[%s3133_s8 + $0x260] sm:$0xff]  ;;  %v266_v30 = vld [vmem:[%s3133_s8 + $0x268] sm:$0xff]  ;;  %v267_v32 = vld [vmem:[%s3133_s8 + $0x270] sm:$0xff] }
  0x3a   : > { %2797 = vmatmul.mubr.msk.f32.gmra.mrb[4].mxu0 %vm326_vm1, %v194_v13  ;;  %v204_v33 = vld [vmem:[%s3133_s8 + $0x78] sm:$0xff]  ;;  %v205_v35 = vld [vmem:[%s3133_s8 + $0x80] sm:$0xff]  ;;  %v206_v37 = vld [vmem:[%s3133_s8 + $0x88] sm:$0xff] }
  0x3b   : > { %2893 = vmatmul.mubr.msk.f32.gmra.mrb[4].mxu1 %vm326_vm1, %v258_v14  ;;  %2799 = vmatprep.mubr.msk.f32.mxu0 %vm326_vm1, %v195_v15  ;;  %v268_v34 = vld [vmem:[%s3133_s8 + $0x278] sm:$0xff]  ;;  %v269_v36 = vld [vmem:[%s3133_s8 + $0x280] sm:$0xff]  ;;  %v270_v38 = vld [vmem:[%s3133_s8 + $0x288] sm:$0xff] }
  0x3c   : > { %2895 = vmatprep.mubr.msk.f32.mxu1 %vm326_vm1, %v259_v16  ;;  %v207_v39 = vld [vmem:[%s3133_s8 + $0x90] sm:$0xff]  ;;  %v208_v41 = vld [vmem:[%s3133_s8 + $0x98] sm:$0xff]  ;;  %v209_v43 = vld [vmem:[%s3133_s8 + $0xa0] sm:$0xff] }
  0x3d   : > { %v271_v40 = vld [vmem:[%s3133_s8 + $0x290] sm:$0xff]  ;;  %v272_v42 = vld [vmem:[%s3133_s8 + $0x298] sm:$0xff]  ;;  %v273_v44 = vld [vmem:[%s3133_s8 + $0x2a0] sm:$0xff] }
  0x3e   : > { %2800 = vmatmul.mubr.msk.f32.gmra.mrb[6].mxu0 %vm326_vm1, %v196_v17  ;;  %v210_v45 = vld [vmem:[%s3133_s8 + $0xa8] sm:$0xff]  ;;  %v211_v47 = vld [vmem:[%s3133_s8 + $0xb0] sm:$0xff]  ;;  %v212_v49 = vld [vmem:[%s3133_s8 + $0xb8] sm:$0xff] }
  0x3f   : > { %2896 = vmatmul.mubr.msk.f32.gmra.mrb[6].mxu1 %vm326_vm1, %v260_v18  ;;  %2802 = vmatprep.mubr.msk.f32.mxu0 %vm326_vm1, %v197_v19  ;;  %v274_v46 = vld [vmem:[%s3133_s8 + $0x2a8] sm:$0xff]  ;;  %v275_v48 = vld [vmem:[%s3133_s8 + $0x2b0] sm:$0xff]  ;;  %v276_v50 = vld [vmem:[%s3133_s8 + $0x2b8] sm:$0xff] }
  0x40   : > { %2898 = vmatprep.mubr.msk.f32.mxu1 %vm326_vm1, %v261_v20  ;;  %v213_v51 = vld [vmem:[%s3133_s8 + $0xc0] sm:$0xff]  ;;  %v214_v53 = vld [vmem:[%s3133_s8 + $0xc8] sm:$0xff]  ;;  %v215_v55 = vld [vmem:[%s3133_s8 + $0xd0] sm:$0xff] }
  0x41   : > { %v277_v52 = vld [vmem:[%s3133_s8 + $0x2c0] sm:$0xff]  ;;  %v278_v54 = vld [vmem:[%s3133_s8 + $0x2c8] sm:$0xff]  ;;  %v279_v56 = vld [vmem:[%s3133_s8 + $0x2d0] sm:$0xff] }
  0x42   : > { %2803 = vmatmul.mubr.msk.f32.gmra.mrb[8].mxu0 %vm326_vm1, %v198_v21  ;;  %v216_v57 = vld [vmem:[%s3133_s8 + $0xd8] sm:$0xff]  ;;  %v217_v59 = vld [vmem:[%s3133_s8 + $0xe0] sm:$0xff]  ;;  %v218_v61 = vld [vmem:[%s3133_s8 + $0xe8] sm:$0xff] }
  0x43   : > { %2899 = vmatmul.mubr.msk.f32.gmra.mrb[8].mxu1 %vm326_vm1, %v262_v22  ;;  %2805 = vmatprep.mubr.msk.f32.mxu0 %vm326_vm1, %v199_v23  ;;  %v280_v58 = vld [vmem:[%s3133_s8 + $0x2d8] sm:$0xff]  ;;  %v281_v60 = vld [vmem:[%s3133_s8 + $0x2e0] sm:$0xff]  ;;  %v282_v62 = vld [vmem:[%s3133_s8 + $0x2e8] sm:$0xff] }
  0x44   : > { %2901 = vmatprep.mubr.msk.f32.mxu1 %vm326_vm1, %v263_v24  ;;  %v219_v63 = vld [vmem:[%s3133_s8 + $0xf0] sm:$0xff]  ;;  %v220_v1 = vld [vmem:[%s3133_s8 + $0xf8] sm:$0xff]  ;;  %v221_v3 = vld [vmem:[%s3133_s8 + $0x100] sm:$0xff] }
  0x45   : > { %v283_v0 = vld [vmem:[%s3133_s8 + $0x2f0] sm:$0xff]  ;;  %v284_v2 = vld [vmem:[%s3133_s8 + $0x2f8] sm:$0xff]  ;;  %v285_v4 = vld [vmem:[%s3133_s8 + $0x300] sm:$0xff] }
  0x46   : > { %2806 = vmatmul.mubr.msk.f32.gmra.mrb[10].mxu0 %vm326_vm1, %v200_v25  ;;  %v222_v5 = vld [vmem:[%s3133_s8 + $0x108] sm:$0xff]  ;;  %v223_v7 = vld [vmem:[%s3133_s8 + $0x110] sm:$0xff]  ;;  %v224_v9 = vld [vmem:[%s3133_s8 + $0x118] sm:$0xff] }
  0x47   : > { %2902 = vmatmul.mubr.msk.f32.gmra.mrb[10].mxu1 %vm326_vm1, %v264_v26  ;;  %2808 = vmatprep.mubr.msk.f32.mxu0 %vm326_vm1, %v201_v27  ;;  %v286_v6 = vld [vmem:[%s3133_s8 + $0x308] sm:$0xff]  ;;  %v287_v8 = vld [vmem:[%s3133_s8 + $0x310] sm:$0xff]  ;;  %v288_v10 = vld [vmem:[%s3133_s8 + $0x318] sm:$0xff] }
  0x48   : > { %2904 = vmatprep.mubr.msk.f32.mxu1 %vm326_vm1, %v265_v28  ;;  %v225_v11 = vld [vmem:[%s3133_s8 + $0x120] sm:$0xff]  ;;  %v226_v13 = vld [vmem:[%s3133_s8 + $0x128] sm:$0xff]  ;;  %v227_v15 = vld [vmem:[%s3133_s8 + $0x130] sm:$0xff] }
  0x49   : > { %v289_v12 = vld [vmem:[%s3133_s8 + $0x320] sm:$0xff]  ;;  %v290_v14 = vld [vmem:[%s3133_s8 + $0x328] sm:$0xff]  ;;  %v291_v16 = vld [vmem:[%s3133_s8 + $0x330] sm:$0xff] }
  0x4a   : > { %2809 = vmatmul.mubr.msk.f32.gmra.mrb[12].mxu0 %vm326_vm1, %v202_v29  ;;  %v228_v17 = vld [vmem:[%s3133_s8 + $0x138] sm:$0xff]  ;;  %v229_v19 = vld [vmem:[%s3133_s8 + $0x140] sm:$0xff]  ;;  %v230_v21 = vld [vmem:[%s3133_s8 + $0x148] sm:$0xff] }
  0x4b   : > { %2905 = vmatmul.mubr.msk.f32.gmra.mrb[12].mxu1 %vm326_vm1, %v266_v30  ;;  %2811 = vmatprep.mubr.msk.f32.mxu0 %vm326_vm1, %v203_v31  ;;  %v292_v18 = vld [vmem:[%s3133_s8 + $0x338] sm:$0xff]  ;;  %v293_v20 = vld [vmem:[%s3133_s8 + $0x340] sm:$0xff]  ;;  %v294_v22 = vld [vmem:[%s3133_s8 + $0x348] sm:$0xff] }
  0x4c   : > { %2907 = vmatprep.mubr.msk.f32.mxu1 %vm326_vm1, %v267_v32  ;;  %v231_v23 = vld [vmem:[%s3133_s8 + $0x150] sm:$0xff]  ;;  %v232_v25 = vld [vmem:[%s3133_s8 + $0x158] sm:$0xff]  ;;  %v233_v27 = vld [vmem:[%s3133_s8 + $0x160] sm:$0xff] }
  0x4d   : > { %v295_v24 = vld [vmem:[%s3133_s8 + $0x350] sm:$0xff]  ;;  %v296_v26 = vld [vmem:[%s3133_s8 + $0x358] sm:$0xff]  ;;  %v297_v28 = vld [vmem:[%s3133_s8 + $0x360] sm:$0xff] }
  0x4e   : > { %2812 = vmatmul.mubr.msk.f32.gmra.mrb[14].mxu0 %vm326_vm1, %v204_v33  ;;  %v234_v29 = vld [vmem:[%s3133_s8 + $0x168] sm:$0xff]  ;;  %v235_v31 = vld [vmem:[%s3133_s8 + $0x170] sm:$0xff]  ;;  %v236_v33 = vld [vmem:[%s3133_s8 + $0x178] sm:$0xff] }
  0x4f   : > { %2908 = vmatmul.mubr.msk.f32.gmra.mrb[14].mxu1 %vm326_vm1, %v268_v34  ;;  %2814 = vmatprep.mubr.msk.f32.mxu0 %vm326_vm1, %v205_v35  ;;  %v298_v30 = vld [vmem:[%s3133_s8 + $0x368] sm:$0xff]  ;;  %v299_v32 = vld [vmem:[%s3133_s8 + $0x370] sm:$0xff]  ;;  %v300_v34 = vld [vmem:[%s3133_s8 + $0x378] sm:$0xff] }
  0x50   : > { %2910 = vmatprep.mubr.msk.f32.mxu1 %vm326_vm1, %v269_v36  ;;  %v237_v35 = vld [vmem:[%s3133_s8 + $0x180] sm:$0xff] }
  0x51   : > { %v301_v36 = vld [vmem:[%s3133_s8 + $0x380] sm:$0xff] }
  0x52   : > { %2815 = vmatmul.mubr.msk.f32.gmra.mrb[16].mxu0 %vm326_vm1, %v206_v37  ;;  %v238_v37 = vld [vmem:[%s3133_s8 + $0x188] sm:$0xff] }
  0x53   : > { %2911 = vmatmul.mubr.msk.f32.gmra.mrb[16].mxu1 %vm326_vm1, %v270_v38  ;;  %2817 = vmatprep.mubr.msk.f32.mxu0 %vm326_vm1, %v207_v39  ;;  %v302_v38 = vld [vmem:[%s3133_s8 + $0x388] sm:$0xff]  ;;  %v239_v39 = vld [vmem:[%s3133_s8 + $0x190] sm:$0xff] }
  0x54   : > { %2913 = vmatprep.mubr.msk.f32.mxu1 %vm326_vm1, %v271_v40  ;;  %v303_v40 = vld [vmem:[%s3133_s8 + $0x390] sm:$0xff] }
  0x56   : > { %2818 = vmatmul.mubr.msk.f32.gmra.mrb[18].mxu0 %vm326_vm1, %v208_v41  ;;  %v240_v41 = vld [vmem:[%s3133_s8 + $0x198] sm:$0xff] }
  0x57   : > { %2914 = vmatmul.mubr.msk.f32.gmra.mrb[18].mxu1 %vm326_vm1, %v272_v42  ;;  %2820 = vmatprep.mubr.msk.f32.mxu0 %vm326_vm1, %v209_v43  ;;  %v304_v42 = vld [vmem:[%s3133_s8 + $0x398] sm:$0xff]  ;;  %v241_v43 = vld [vmem:[%s3133_s8 + $0x1a0] sm:$0xff] }
  0x58   : > { %2916 = vmatprep.mubr.msk.f32.mxu1 %vm326_vm1, %v273_v44  ;;  %v305_v44 = vld [vmem:[%s3133_s8 + $0x3a0] sm:$0xff] }
  0x5a   : > { %2821 = vmatmul.mubr.msk.f32.gmra.mrb[20].mxu0 %vm326_vm1, %v210_v45  ;;  %v242_v45 = vld [vmem:[%s3133_s8 + $0x1a8] sm:$0xff] }
  0x5b   : > { %2917 = vmatmul.mubr.msk.f32.gmra.mrb[20].mxu1 %vm326_vm1, %v274_v46  ;;  %2823 = vmatprep.mubr.msk.f32.mxu0 %vm326_vm1, %v211_v47  ;;  %v306_v46 = vld [vmem:[%s3133_s8 + $0x3a8] sm:$0xff]  ;;  %v243_v47 = vld [vmem:[%s3133_s8 + $0x1b0] sm:$0xff] }
  0x5c   : > { %2919 = vmatprep.mubr.msk.f32.mxu1 %vm326_vm1, %v275_v48  ;;  %v307_v48 = vld [vmem:[%s3133_s8 + $0x3b0] sm:$0xff] }
  0x5e   : > { %2824 = vmatmul.mubr.msk.f32.gmra.mrb[22].mxu0 %vm326_vm1, %v212_v49  ;;  %v244_v49 = vld [vmem:[%s3133_s8 + $0x1b8] sm:$0xff] }
  0x5f   : > { %2920 = vmatmul.mubr.msk.f32.gmra.mrb[22].mxu1 %vm326_vm1, %v276_v50  ;;  %2826 = vmatprep.mubr.msk.f32.mxu0 %vm326_vm1, %v213_v51  ;;  %v308_v50 = vld [vmem:[%s3133_s8 + $0x3b8] sm:$0xff]  ;;  %v245_v51 = vld [vmem:[%s3133_s8 + $0x1c0] sm:$0xff] }
  0x60   : > { %2922 = vmatprep.mubr.msk.f32.mxu1 %vm326_vm1, %v277_v52  ;;  %v309_v52 = vld [vmem:[%s3133_s8 + $0x3c0] sm:$0xff] }
  0x62   : > { %2827 = vmatmul.mubr.msk.f32.gmra.mrb[24].mxu0 %vm326_vm1, %v214_v53  ;;  %v246_v53 = vld [vmem:[%s3133_s8 + $0x1c8] sm:$0xff] }
  0x63   : > { %2923 = vmatmul.mubr.msk.f32.gmra.mrb[24].mxu1 %vm326_vm1, %v278_v54  ;;  %2829 = vmatprep.mubr.msk.f32.mxu0 %vm326_vm1, %v215_v55  ;;  %v310_v54 = vld [vmem:[%s3133_s8 + $0x3c8] sm:$0xff]  ;;  %v247_v55 = vld [vmem:[%s3133_s8 + $0x1d0] sm:$0xff] }
  0x64   : > { %2925 = vmatprep.mubr.msk.f32.mxu1 %vm326_vm1, %v279_v56  ;;  %v311_v56 = vld [vmem:[%s3133_s8 + $0x3d0] sm:$0xff] }
  0x66   : > { %2830 = vmatmul.mubr.msk.f32.gmra.mrb[26].mxu0 %vm326_vm1, %v216_v57  ;;  %v248_v57 = vld [vmem:[%s3133_s8 + $0x1d8] sm:$0xff] }
  0x67   : > { %2926 = vmatmul.mubr.msk.f32.gmra.mrb[26].mxu1 %vm326_vm1, %v280_v58  ;;  %2832 = vmatprep.mubr.msk.f32.mxu0 %vm326_vm1, %v217_v59  ;;  %v312_v58 = vld [vmem:[%s3133_s8 + $0x3d8] sm:$0xff]  ;;  %v249_v59 = vld [vmem:[%s3133_s8 + $0x1e0] sm:$0xff] }
  0x68   : > { %2928 = vmatprep.mubr.msk.f32.mxu1 %vm326_vm1, %v281_v60  ;;  %v313_v60 = vld [vmem:[%s3133_s8 + $0x3e0] sm:$0xff] }
  0x6a   : > { %2833 = vmatmul.mubr.msk.f32.gmra.mrb[28].mxu0 %vm326_vm1, %v218_v61  ;;  %v250_v61 = vld [vmem:[%s3133_s8 + $0x1e8] sm:$0xff] }
  0x6b   : > { %2929 = vmatmul.mubr.msk.f32.gmra.mrb[28].mxu1 %vm326_vm1, %v282_v62  ;;  %2835 = vmatprep.mubr.msk.f32.mxu0 %vm326_vm1, %v219_v63  ;;  %v314_v62 = vld [vmem:[%s3133_s8 + $0x3e8] sm:$0xff]  ;;  %v251_v63 = vld [vmem:[%s3133_s8 + $0x1f0] sm:$0xff] }
  0x6c   : > { %2931 = vmatprep.mubr.msk.f32.mxu1 %vm326_vm1, %v283_v0  ;;  %v315_v0 = vld [vmem:[%s3133_s8 + $0x3f0] sm:$0xff] }
  0x6e   : > { %2836 = vmatmul.mubr.msk.f32.gmra.mrb[30].mxu0 %vm326_vm1, %v220_v1  ;;  %v252_v1 = vld [vmem:[%s3133_s8 + $0x1f8] sm:$0xff] }
  0x6f   : > { %2932 = vmatmul.mubr.msk.f32.gmra.mrb[30].mxu1 %vm326_vm1, %v284_v2  ;;  %2838 = vmatprep.mubr.msk.f32.mxu0 %vm326_vm1, %v221_v3  ;;  %v316_v2 = vld [vmem:[%s3133_s8 + $0x3f8] sm:$0xff]  ;;  %v3394_v3 = vld [vmem:[%s3796_s2] ss:$0 sm:$0xff] }
  0x70   : > { %2934 = vmatprep.mubr.msk.f32.mxu1 %vm326_vm1, %v285_v4 }
  0x72   : > { %2839 = vmatmul.mubr.msk.f32.gmra.mrb[32].mxu0 %vm326_vm1, %v222_v5 }
  0x73   : > { %2935 = vmatmul.mubr.msk.f32.gmra.mrb[32].mxu1 %vm326_vm1, %v286_v6  ;;  %2841 = vmatprep.mubr.msk.f32.mxu0 %vm326_vm1, %v223_v7 }
  0x74   : > { %2937 = vmatprep.mubr.msk.f32.mxu1 %vm326_vm1, %v287_v8 }
  0x76   : > { %2842 = vmatmul.mubr.msk.f32.gmra.mrb[34].mxu0 %vm326_vm1, %v224_v9 }
  0x77   : > { %2938 = vmatmul.mubr.msk.f32.gmra.mrb[34].mxu1 %vm326_vm1, %v288_v10  ;;  %2844 = vmatprep.mubr.msk.f32.mxu0 %vm326_vm1, %v225_v11 }
  0x78   : > { %2940 = vmatprep.mubr.msk.f32.mxu1 %vm326_vm1, %v289_v12 }
  0x7a   : > { %2845 = vmatmul.mubr.msk.f32.gmra.mrb[36].mxu0 %vm326_vm1, %v226_v13 }
  0x7b   : > { %2941 = vmatmul.mubr.msk.f32.gmra.mrb[36].mxu1 %vm326_vm1, %v290_v14  ;;  %2847 = vmatprep.mubr.msk.f32.mxu0 %vm326_vm1, %v227_v15 }
  0x7c   : > { %2943 = vmatprep.mubr.msk.f32.mxu1 %vm326_vm1, %v291_v16 }
  0x7e   : > { %2848 = vmatmul.mubr.msk.f32.gmra.mrb[38].mxu0 %vm326_vm1, %v228_v17 }
  0x7f   : > { %2944 = vmatmul.mubr.msk.f32.gmra.mrb[38].mxu1 %vm326_vm1, %v292_v18  ;;  %2850 = vmatprep.mubr.msk.f32.mxu0 %vm326_vm1, %v229_v19 }
  0x80   : > { %2946 = vmatprep.mubr.msk.f32.mxu1 %vm326_vm1, %v293_v20 }
  0x82   : > { %2851 = vmatmul.mubr.msk.f32.gmra.mrb[40].mxu0 %vm326_vm1, %v230_v21 }
  0x83   : > { %2947 = vmatmul.mubr.msk.f32.gmra.mrb[40].mxu1 %vm326_vm1, %v294_v22  ;;  %2853 = vmatprep.mubr.msk.f32.mxu0 %vm326_vm1, %v231_v23 }
  0x84   : > { %2949 = vmatprep.mubr.msk.f32.mxu1 %vm326_vm1, %v295_v24 }
  0x86   : > { %2854 = vmatmul.mubr.msk.f32.gmra.mrb[42].mxu0 %vm326_vm1, %v232_v25 }
  0x87   : > { %2950 = vmatmul.mubr.msk.f32.gmra.mrb[42].mxu1 %vm326_vm1, %v296_v26  ;;  %2856 = vmatprep.mubr.msk.f32.mxu0 %vm326_vm1, %v233_v27 }
  0x88   : > { %2952 = vmatprep.mubr.msk.f32.mxu1 %vm326_vm1, %v297_v28 }
  0x8a   : > { %2857 = vmatmul.mubr.msk.f32.gmra.mrb[44].mxu0 %vm326_vm1, %v234_v29 }
  0x8b   : > { %2953 = vmatmul.mubr.msk.f32.gmra.mrb[44].mxu1 %vm326_vm1, %v298_v30  ;;  %2859 = vmatprep.mubr.msk.f32.mxu0 %vm326_vm1, %v235_v31 }
  0x8c   : > { %2955 = vmatprep.mubr.msk.f32.mxu1 %vm326_vm1, %v299_v32 }
  0x8e   : > { %2860 = vmatmul.mubr.msk.f32.gmra.mrb[46].mxu0 %vm326_vm1, %v236_v33 }
  0x8f   : > { %2956 = vmatmul.mubr.msk.f32.gmra.mrb[46].mxu1 %vm326_vm1, %v300_v34  ;;  %2862 = vmatprep.mubr.msk.f32.mxu0 %vm326_vm1, %v237_v35 }
  0x90   : > { %2958 = vmatprep.mubr.msk.f32.mxu1 %vm326_vm1, %v301_v36 }
  0x92   : > { %2863 = vmatmul.mubr.msk.f32.gmra.mrb[48].mxu0 %vm326_vm1, %v238_v37 }
  0x93   : > { %2959 = vmatmul.mubr.msk.f32.gmra.mrb[48].mxu1 %vm326_vm1, %v302_v38  ;;  %2865 = vmatprep.mubr.msk.f32.mxu0 %vm326_vm1, %v239_v39 }
  0x94   : > { %2961 = vmatprep.mubr.msk.f32.mxu1 %vm326_vm1, %v303_v40 }
  0x96   : > { %2866 = vmatmul.mubr.msk.f32.gmra.mrb[50].mxu0 %vm326_vm1, %v240_v41 }
  0x97   : > { %2962 = vmatmul.mubr.msk.f32.gmra.mrb[50].mxu1 %vm326_vm1, %v304_v42  ;;  %2868 = vmatprep.mubr.msk.f32.mxu0 %vm326_vm1, %v241_v43 }
  0x98   : > { %2964 = vmatprep.mubr.msk.f32.mxu1 %vm326_vm1, %v305_v44 }
  0x9a   : > { %2869 = vmatmul.mubr.msk.f32.gmra.mrb[52].mxu0 %vm326_vm1, %v242_v45 }
  0x9b   : > { %2965 = vmatmul.mubr.msk.f32.gmra.mrb[52].mxu1 %vm326_vm1, %v306_v46  ;;  %2871 = vmatprep.mubr.msk.f32.mxu0 %vm326_vm1, %v243_v47 }
  0x9c   : > { %2967 = vmatprep.mubr.msk.f32.mxu1 %vm326_vm1, %v307_v48 }
  0x9e   : > { %2872 = vmatmul.mubr.msk.f32.gmra.mrb[54].mxu0 %vm326_vm1, %v244_v49 }
  0x9f   : > { %2968 = vmatmul.mubr.msk.f32.gmra.mrb[54].mxu1 %vm326_vm1, %v308_v50  ;;  %2874 = vmatprep.mubr.msk.f32.mxu0 %vm326_vm1, %v245_v51 }
  0xa0   : > { %2970 = vmatprep.mubr.msk.f32.mxu1 %vm326_vm1, %v309_v52 }
  0xa2   : > { %2875 = vmatmul.mubr.msk.f32.gmra.mrb[56].mxu0 %vm326_vm1, %v246_v53 }
  0xa3   : > { %2971 = vmatmul.mubr.msk.f32.gmra.mrb[56].mxu1 %vm326_vm1, %v310_v54  ;;  %2877 = vmatprep.mubr.msk.f32.mxu0 %vm326_vm1, %v247_v55 }
  0xa4   : > { %2973 = vmatprep.mubr.msk.f32.mxu1 %vm326_vm1, %v311_v56 }
  0xa6   : > { %2878 = vmatmul.mubr.msk.f32.gmra.mrb[58].mxu0 %vm326_vm1, %v248_v57 }
  0xa7   : > { %2974 = vmatmul.mubr.msk.f32.gmra.mrb[58].mxu1 %vm326_vm1, %v312_v58  ;;  %2880 = vmatprep.mubr.msk.f32.mxu0 %vm326_vm1, %v249_v59 }
  0xa8   : > { %2976 = vmatprep.mubr.msk.f32.mxu1 %vm326_vm1, %v313_v60 }
  0xaa   : > { %2881 = vmatmul.mubr.msk.f32.gmra.mrb[60].mxu0 %vm326_vm1, %v250_v61 }
  0xab   : > { %2977 = vmatmul.mubr.msk.f32.gmra.mrb[60].mxu1 %vm326_vm1, %v314_v62  ;;  %2883 = vmatprep.mubr.msk.f32.mxu0 %vm326_vm1, %v251_v63 }
  0xac   : > { %2979 = vmatprep.mubr.msk.f32.mxu1 %vm326_vm1, %v315_v0 }
  0xae   : > { %2884 = vmatmul.mubr.msk.f32.gmra.mrb[62].mxu0 %vm326_vm1, %v252_v1 }
  0xaf   : > { %2980 = vmatmul.mubr.msk.f32.gmra.mrb[62].mxu1 %vm326_vm1, %v316_v2 }
 0x105   : > { %v2792_v4 = vpop.f32.mrb[0].mxu0 }
 0x106   : > { %v2888_v5 = vpop.f32.mrb[0].mxu1  ;;  %v787_v6 = vadd.f32 %v2792_v4, %v3394_v3  ;;  %v781_v8 = vpop.f32.mrb[1].mxu0 }
 0x107   : > { %v1107_v7 = vadd.f32 %v2888_v5, %v3394_v3  ;;  %v1101_v9 = vpop.f32.mrb[1].mxu1  ;;  %v782_v10 = vadd.f32 %v3394_v3, %v781_v8 }
 0x108   : > { %v1102_v11 = vadd.f32 %v3394_v3, %v1101_v9  ;;  %v1421_v12 = vmax.f32 %v787_v6, 0.0 }
 0x109   : > { %v1485_v13 = vmax.f32 %v1107_v7, 0.0  ;;  %v1420_v14 = vmax.f32 %v782_v10, 0.0  ;;  %v2795_v16 = vpop.f32.mrb[2].mxu0 }
 0x10a   : > { %v1484_v15 = vmax.f32 %v1102_v11, 0.0  ;;  %v2891_v17 = vpop.f32.mrb[2].mxu1  ;;  %v2529_v18 = vpack.c.bf16 %v1421_v12, %v1421_v12  ;;  %v797_v20 = vadd.f32 %v2795_v16, %v3394_v3  ;;  %v791_v22 = vpop.f32.mrb[3].mxu0 }
 0x10b   : > { %v2593_v19 = vpack.c.bf16 %v1485_v13, %v1485_v13  ;;  %v1117_v21 = vadd.f32 %v2891_v17, %v3394_v3  ;;  %v1111_v23 = vpop.f32.mrb[3].mxu1  ;;  %v2528_v24 = vpack.c.bf16 %v1420_v14, %v1420_v14  ;;  %v792_v26 = vadd.f32 %v3394_v3, %v791_v22 }
 0x10c   : > { %v2592_v25 = vpack.c.bf16 %v1484_v15, %v1484_v15  ;;  %v1112_v27 = vadd.f32 %v3394_v3, %v1111_v23  ;;  %2062 = vst.msk [vmem:[%s3404_s15 + $0x4] sm:$0xf] %vm2060_vm4, %v2529_v18  ;;  %v1423_v28 = vmax.f32 %v797_v20, 0.0 }
 0x10d   : > { %2126 = vst.msk [vmem:[%s3404_s15 + $0x104] sm:$0xf] %vm2060_vm4, %v2593_v19  ;;  %v1487_v29 = vmax.f32 %v1117_v21, 0.0  ;;  %2061 = vst.msk [vmem:[%s3404_s15] sm:$0xf] %vm2060_vm4, %v2528_v24  ;;  %v1422_v30 = vmax.f32 %v792_v26, 0.0 }
 0x10e   : > { %2125 = vst.msk [vmem:[%s3404_s15 + $0x100] sm:$0xf] %vm2060_vm4, %v2592_v25  ;;  %v1486_v31 = vmax.f32 %v1112_v27, 0.0  ;;  %v2798_v32 = vpop.f32.mrb[4].mxu0  ;;  %v2894_v33 = vpop.f32.mrb[4].mxu1  ;;  %v2531_v34 = vpack.c.bf16 %v1423_v28, %v1423_v28 }
 0x10f   : > { %v2595_v35 = vpack.c.bf16 %v1487_v29, %v1487_v29  ;;  %v807_v36 = vadd.f32 %v2798_v32, %v3394_v3  ;;  %v1127_v37 = vadd.f32 %v2894_v33, %v3394_v3  ;;  %v801_v38 = vpop.f32.mrb[5].mxu0  ;;  %v1121_v39 = vpop.f32.mrb[5].mxu1  ;;  %v2530_v40 = vpack.c.bf16 %v1422_v30, %v1422_v30 }
 0x110   : > { %v2594_v41 = vpack.c.bf16 %v1486_v31, %v1486_v31  ;;  %v802_v42 = vadd.f32 %v3394_v3, %v801_v38  ;;  %v1122_v43 = vadd.f32 %v3394_v3, %v1121_v39  ;;  %2064 = vst.msk [vmem:[%s3404_s15 + $0xc] sm:$0xf] %vm2060_vm4, %v2531_v34 }
 0x111   : > { %2128 = vst.msk [vmem:[%s3404_s15 + $0x10c] sm:$0xf] %vm2060_vm4, %v2595_v35  ;;  %v1425_v44 = vmax.f32 %v807_v36, 0.0  ;;  %v1489_v45 = vmax.f32 %v1127_v37, 0.0  ;;  %2063 = vst.msk [vmem:[%s3404_s15 + $0x8] sm:$0xf] %vm2060_vm4, %v2530_v40 }
 0x112   : > { %2127 = vst.msk [vmem:[%s3404_s15 + $0x108] sm:$0xf] %vm2060_vm4, %v2594_v41  ;;  %v1424_v46 = vmax.f32 %v802_v42, 0.0  ;;  %v1488_v47 = vmax.f32 %v1122_v43, 0.0  ;;  %v2801_v48 = vpop.f32.mrb[6].mxu0  ;;  %v2897_v49 = vpop.f32.mrb[6].mxu1 }
 0x113   : > { %v2533_v50 = vpack.c.bf16 %v1425_v44, %v1425_v44  ;;  %v2597_v51 = vpack.c.bf16 %v1489_v45, %v1489_v45  ;;  %v817_v52 = vadd.f32 %v2801_v48, %v3394_v3  ;;  %v1137_v53 = vadd.f32 %v2897_v49, %v3394_v3  ;;  %v811_v54 = vpop.f32.mrb[7].mxu0  ;;  %v1131_v55 = vpop.f32.mrb[7].mxu1 }
 0x114   : > { %v2532_v56 = vpack.c.bf16 %v1424_v46, %v1424_v46  ;;  %v2596_v57 = vpack.c.bf16 %v1488_v47, %v1488_v47  ;;  %v812_v58 = vadd.f32 %v3394_v3, %v811_v54  ;;  %v1132_v59 = vadd.f32 %v3394_v3, %v1131_v55 }
 0x115   : > { %2066 = vst.msk [vmem:[%s3404_s15 + $0x14] sm:$0xf] %vm2060_vm4, %v2533_v50  ;;  %2130 = vst.msk [vmem:[%s3404_s15 + $0x114] sm:$0xf] %vm2060_vm4, %v2597_v51  ;;  %v1427_v60 = vmax.f32 %v817_v52, 0.0  ;;  %v1491_v61 = vmax.f32 %v1137_v53, 0.0 }
 0x116   : > { %2065 = vst.msk [vmem:[%s3404_s15 + $0x10] sm:$0xf] %vm2060_vm4, %v2532_v56  ;;  %2129 = vst.msk [vmem:[%s3404_s15 + $0x110] sm:$0xf] %vm2060_vm4, %v2596_v57  ;;  %v1426_v62 = vmax.f32 %v812_v58, 0.0  ;;  %v1490_v63 = vmax.f32 %v1132_v59, 0.0 }
 0x117   : > { %v2804_v0 = vpop.f32.mrb[8].mxu0  ;;  %v2900_v1 = vpop.f32.mrb[8].mxu1  ;;  %v2535_v2 = vpack.c.bf16 %v1427_v60, %v1427_v60  ;;  %v2599_v4 = vpack.c.bf16 %v1491_v61, %v1491_v61 }
 0x118   : > { %v827_v5 = vadd.f32 %v2804_v0, %v3394_v3  ;;  %v1147_v6 = vadd.f32 %v2900_v1, %v3394_v3  ;;  %v821_v7 = vpop.f32.mrb[9].mxu0  ;;  %v1141_v8 = vpop.f32.mrb[9].mxu1  ;;  %v2534_v9 = vpack.c.bf16 %v1426_v62, %v1426_v62  ;;  %v2598_v10 = vpack.c.bf16 %v1490_v63, %v1490_v63 }
 0x119   : > { %v822_v11 = vadd.f32 %v3394_v3, %v821_v7  ;;  %v1142_v12 = vadd.f32 %v3394_v3, %v1141_v8  ;;  %2068 = vst.msk [vmem:[%s3404_s15 + $0x1c] sm:$0xf] %vm2060_vm4, %v2535_v2  ;;  %2132 = vst.msk [vmem:[%s3404_s15 + $0x11c] sm:$0xf] %vm2060_vm4, %v2599_v4  ;;  %v2807_v17 = vpop.f32.mrb[10].mxu0 }
 0x11a   : > { %v1429_v13 = vmax.f32 %v827_v5, 0.0  ;;  %v1493_v14 = vmax.f32 %v1147_v6, 0.0  ;;  %2067 = vst.msk [vmem:[%s3404_s15 + $0x18] sm:$0xf] %vm2060_vm4, %v2534_v9  ;;  %2131 = vst.msk [vmem:[%s3404_s15 + $0x118] sm:$0xf] %vm2060_vm4, %v2598_v10  ;;  %v837_v21 = vadd.f32 %v2807_v17, %v3394_v3 }
 0x11b   : > { %v1428_v15 = vmax.f32 %v822_v11, 0.0  ;;  %v1492_v16 = vmax.f32 %v1142_v12, 0.0  ;;  %v2903_v18 = vpop.f32.mrb[10].mxu1  ;;  %v831_v23 = vpop.f32.mrb[11].mxu0 }
 0x11c   : > { %v2537_v19 = vpack.c.bf16 %v1429_v13, %v1429_v13  ;;  %v2601_v20 = vpack.c.bf16 %v1493_v14, %v1493_v14  ;;  %v1157_v22 = vadd.f32 %v2903_v18, %v3394_v3  ;;  %v1151_v24 = vpop.f32.mrb[11].mxu1  ;;  %v832_v27 = vadd.f32 %v3394_v3, %v831_v23 }
 0x11d   : > { %v2536_v25 = vpack.c.bf16 %v1428_v15, %v1428_v15  ;;  %v2600_v26 = vpack.c.bf16 %v1492_v16, %v1492_v16  ;;  %v1152_v28 = vadd.f32 %v3394_v3, %v1151_v24  ;;  %v1431_v29 = vmax.f32 %v837_v21, 0.0  ;;  %v2810_v33 = vpop.f32.mrb[12].mxu0 }
 0x11e   : > { %2070 = vst.msk [vmem:[%s3404_s15 + $0x24] sm:$0xf] %vm2060_vm4, %v2537_v19  ;;  %2134 = vst.msk [vmem:[%s3404_s15 + $0x124] sm:$0xf] %vm2060_vm4, %v2601_v20  ;;  %v1495_v30 = vmax.f32 %v1157_v22, 0.0  ;;  %v1430_v31 = vmax.f32 %v832_v27, 0.0  ;;  %v847_v37 = vadd.f32 %v2810_v33, %v3394_v3 }
 0x11f   : > { %2069 = vst.msk [vmem:[%s3404_s15 + $0x20] sm:$0xf] %vm2060_vm4, %v2536_v25  ;;  %2133 = vst.msk [vmem:[%s3404_s15 + $0x120] sm:$0xf] %vm2060_vm4, %v2600_v26  ;;  %v1494_v32 = vmax.f32 %v1152_v28, 0.0  ;;  %v2906_v34 = vpop.f32.mrb[12].mxu1  ;;  %v2539_v35 = vpack.c.bf16 %v1431_v29, %v1431_v29 }
 0x120   : > { %v2603_v36 = vpack.c.bf16 %v1495_v30, %v1495_v30  ;;  %v1167_v38 = vadd.f32 %v2906_v34, %v3394_v3  ;;  %v841_v39 = vpop.f32.mrb[13].mxu0  ;;  %v1161_v40 = vpop.f32.mrb[13].mxu1  ;;  %v2538_v41 = vpack.c.bf16 %v1430_v31, %v1430_v31  ;;  %v1433_v45 = vmax.f32 %v847_v37, 0.0 }
 0x121   : > { %v2602_v42 = vpack.c.bf16 %v1494_v32, %v1494_v32  ;;  %v842_v43 = vadd.f32 %v3394_v3, %v841_v39  ;;  %v1162_v44 = vadd.f32 %v3394_v3, %v1161_v40  ;;  %2072 = vst.msk [vmem:[%s3404_s15 + $0x2c] sm:$0xf] %vm2060_vm4, %v2539_v35  ;;  %v2813_v49 = vpop.f32.mrb[14].mxu0 }
 0x122   : > { %2136 = vst.msk [vmem:[%s3404_s15 + $0x12c] sm:$0xf] %vm2060_vm4, %v2603_v36  ;;  %v1497_v46 = vmax.f32 %v1167_v38, 0.0  ;;  %2071 = vst.msk [vmem:[%s3404_s15 + $0x28] sm:$0xf] %vm2060_vm4, %v2538_v41  ;;  %v2909_v50 = vpop.f32.mrb[14].mxu1  ;;  %v2541_v51 = vpack.c.bf16 %v1433_v45, %v1433_v45  ;;  %v857_v53 = vadd.f32 %v2813_v49, %v3394_v3 }
 0x123   : > { %2135 = vst.msk [vmem:[%s3404_s15 + $0x128] sm:$0xf] %vm2060_vm4, %v2602_v42  ;;  %v1432_v47 = vmax.f32 %v842_v43, 0.0  ;;  %v1496_v48 = vmax.f32 %v1162_v44, 0.0  ;;  %v1177_v54 = vadd.f32 %v2909_v50, %v3394_v3  ;;  %v851_v55 = vpop.f32.mrb[15].mxu0  ;;  %v1171_v56 = vpop.f32.mrb[15].mxu1 }
 0x124   : > { %v2605_v52 = vpack.c.bf16 %v1497_v46, %v1497_v46  ;;  %v852_v59 = vadd.f32 %v3394_v3, %v851_v55  ;;  %v1172_v60 = vadd.f32 %v3394_v3, %v1171_v56  ;;  %2074 = vst.msk [vmem:[%s3404_s15 + $0x34] sm:$0xf] %vm2060_vm4, %v2541_v51  ;;  %v1435_v61 = vmax.f32 %v857_v53, 0.0 }
 0x125   : > { %v2540_v57 = vpack.c.bf16 %v1432_v47, %v1432_v47  ;;  %v2604_v58 = vpack.c.bf16 %v1496_v48, %v1496_v48  ;;  %v1499_v62 = vmax.f32 %v1177_v54, 0.0  ;;  %v2816_v1 = vpop.f32.mrb[16].mxu0 }
 0x126   : > { %2138 = vst.msk [vmem:[%s3404_s15 + $0x134] sm:$0xf] %vm2060_vm4, %v2605_v52  ;;  %v1434_v63 = vmax.f32 %v852_v59, 0.0  ;;  %v1498_v0 = vmax.f32 %v1172_v60, 0.0  ;;  %v2912_v2 = vpop.f32.mrb[16].mxu1  ;;  %v2543_v4 = vpack.c.bf16 %v1435_v61, %v1435_v61  ;;  %v867_v6 = vadd.f32 %v2816_v1, %v3394_v3  ;;  %v861_v8 = vpop.f32.mrb[17].mxu0 }
 0x127   : > { %2073 = vst.msk [vmem:[%s3404_s15 + $0x30] sm:$0xf] %vm2060_vm4, %v2540_v57  ;;  %2137 = vst.msk [vmem:[%s3404_s15 + $0x130] sm:$0xf] %vm2060_vm4, %v2604_v58  ;;  %v2607_v5 = vpack.c.bf16 %v1499_v62, %v1499_v62  ;;  %v1187_v7 = vadd.f32 %v2912_v2, %v3394_v3  ;;  %v1181_v9 = vpop.f32.mrb[17].mxu1  ;;  %v862_v12 = vadd.f32 %v3394_v3, %v861_v8 }
 0x128   : > { %v2542_v10 = vpack.c.bf16 %v1434_v63, %v1434_v63  ;;  %v2606_v11 = vpack.c.bf16 %v1498_v0, %v1498_v0  ;;  %v1182_v13 = vadd.f32 %v3394_v3, %v1181_v9  ;;  %2076 = vst.msk [vmem:[%s3404_s15 + $0x3c] sm:$0xf] %vm2060_vm4, %v2543_v4  ;;  %v1437_v14 = vmax.f32 %v867_v6, 0.0 }
 0x129   : > { %2140 = vst.msk [vmem:[%s3404_s15 + $0x13c] sm:$0xf] %vm2060_vm4, %v2607_v5  ;;  %v1501_v15 = vmax.f32 %v1187_v7, 0.0  ;;  %v1436_v16 = vmax.f32 %v862_v12, 0.0  ;;  %v2819_v18 = vpop.f32.mrb[18].mxu0 }
 0x12a   : > { %2075 = vst.msk [vmem:[%s3404_s15 + $0x38] sm:$0xf] %vm2060_vm4, %v2542_v10  ;;  %2139 = vst.msk [vmem:[%s3404_s15 + $0x138] sm:$0xf] %vm2060_vm4, %v2606_v11  ;;  %v1500_v17 = vmax.f32 %v1182_v13, 0.0  ;;  %v2915_v19 = vpop.f32.mrb[18].mxu1  ;;  %v2545_v20 = vpack.c.bf16 %v1437_v14, %v1437_v14  ;;  %v877_v22 = vadd.f32 %v2819_v18, %v3394_v3 }
 0x12b   : > { %v2609_v21 = vpack.c.bf16 %v1501_v15, %v1501_v15  ;;  %v1197_v23 = vadd.f32 %v2915_v19, %v3394_v3  ;;  %v871_v24 = vpop.f32.mrb[19].mxu0  ;;  %v1191_v25 = vpop.f32.mrb[19].mxu1  ;;  %v2544_v26 = vpack.c.bf16 %v1436_v16, %v1436_v16 }
 0x12c   : > { %v2608_v27 = vpack.c.bf16 %v1500_v17, %v1500_v17  ;;  %v872_v28 = vadd.f32 %v3394_v3, %v871_v24  ;;  %v1192_v29 = vadd.f32 %v3394_v3, %v1191_v25  ;;  %2078 = vst.msk [vmem:[%s3404_s15 + $0x44] sm:$0xf] %vm2060_vm4, %v2545_v20  ;;  %v1439_v30 = vmax.f32 %v877_v22, 0.0 }
 0x12d   : > { %2142 = vst.msk [vmem:[%s3404_s15 + $0x144] sm:$0xf] %vm2060_vm4, %v2609_v21  ;;  %v1503_v31 = vmax.f32 %v1197_v23, 0.0  ;;  %2077 = vst.msk [vmem:[%s3404_s15 + $0x40] sm:$0xf] %vm2060_vm4, %v2544_v26  ;;  %v2822_v34 = vpop.f32.mrb[20].mxu0 }
 0x12e   : > { %2141 = vst.msk [vmem:[%s3404_s15 + $0x140] sm:$0xf] %vm2060_vm4, %v2608_v27  ;;  %v1438_v32 = vmax.f32 %v872_v28, 0.0  ;;  %v1502_v33 = vmax.f32 %v1192_v29, 0.0  ;;  %v2918_v35 = vpop.f32.mrb[20].mxu1  ;;  %v2547_v36 = vpack.c.bf16 %v1439_v30, %v1439_v30  ;;  %v887_v38 = vadd.f32 %v2822_v34, %v3394_v3  ;;  %v881_v40 = vpop.f32.mrb[21].mxu0 }
 0x12f   : > { %v2611_v37 = vpack.c.bf16 %v1503_v31, %v1503_v31  ;;  %v1207_v39 = vadd.f32 %v2918_v35, %v3394_v3  ;;  %v1201_v41 = vpop.f32.mrb[21].mxu1  ;;  %v882_v44 = vadd.f32 %v3394_v3, %v881_v40 }
 0x130   : > { %v2546_v42 = vpack.c.bf16 %v1438_v32, %v1438_v32  ;;  %v2610_v43 = vpack.c.bf16 %v1502_v33, %v1502_v33  ;;  %v1202_v45 = vadd.f32 %v3394_v3, %v1201_v41  ;;  %2080 = vst.msk [vmem:[%s3404_s15 + $0x4c] sm:$0xf] %vm2060_vm4, %v2547_v36  ;;  %v1441_v46 = vmax.f32 %v887_v38, 0.0 }
 0x131   : > { %2144 = vst.msk [vmem:[%s3404_s15 + $0x14c] sm:$0xf] %vm2060_vm4, %v2611_v37  ;;  %v1505_v47 = vmax.f32 %v1207_v39, 0.0  ;;  %v1440_v48 = vmax.f32 %v882_v44, 0.0  ;;  %v2825_v50 = vpop.f32.mrb[22].mxu0 }
 0x132   : > { %2079 = vst.msk [vmem:[%s3404_s15 + $0x48] sm:$0xf] %vm2060_vm4, %v2546_v42  ;;  %2143 = vst.msk [vmem:[%s3404_s15 + $0x148] sm:$0xf] %vm2060_vm4, %v2610_v43  ;;  %v1504_v49 = vmax.f32 %v1202_v45, 0.0  ;;  %v2921_v51 = vpop.f32.mrb[22].mxu1  ;;  %v2549_v52 = vpack.c.bf16 %v1441_v46, %v1441_v46  ;;  %v897_v54 = vadd.f32 %v2825_v50, %v3394_v3 }
 0x133   : > { %v2613_v53 = vpack.c.bf16 %v1505_v47, %v1505_v47  ;;  %v1217_v55 = vadd.f32 %v2921_v51, %v3394_v3  ;;  %v891_v56 = vpop.f32.mrb[23].mxu0  ;;  %v1211_v57 = vpop.f32.mrb[23].mxu1  ;;  %v2548_v58 = vpack.c.bf16 %v1440_v48, %v1440_v48 }
 0x134   : > { %v2612_v59 = vpack.c.bf16 %v1504_v49, %v1504_v49  ;;  %v892_v60 = vadd.f32 %v3394_v3, %v891_v56  ;;  %v1212_v61 = vadd.f32 %v3394_v3, %v1211_v57  ;;  %2082 = vst.msk [vmem:[%s3404_s15 + $0x54] sm:$0xf] %vm2060_vm4, %v2549_v52  ;;  %v1443_v62 = vmax.f32 %v897_v54, 0.0 }
 0x135   : > { %2146 = vst.msk [vmem:[%s3404_s15 + $0x154] sm:$0xf] %vm2060_vm4, %v2613_v53  ;;  %v1507_v63 = vmax.f32 %v1217_v55, 0.0  ;;  %2081 = vst.msk [vmem:[%s3404_s15 + $0x50] sm:$0xf] %vm2060_vm4, %v2548_v58  ;;  %v2828_v2 = vpop.f32.mrb[24].mxu0 }
 0x136   : > { %2145 = vst.msk [vmem:[%s3404_s15 + $0x150] sm:$0xf] %vm2060_vm4, %v2612_v59  ;;  %v1442_v0 = vmax.f32 %v892_v60, 0.0  ;;  %v1506_v1 = vmax.f32 %v1212_v61, 0.0  ;;  %v2924_v4 = vpop.f32.mrb[24].mxu1  ;;  %v2551_v5 = vpack.c.bf16 %v1443_v62, %v1443_v62  ;;  %v907_v7 = vadd.f32 %v2828_v2, %v3394_v3  ;;  %v901_v9 = vpop.f32.mrb[25].mxu0 }
 0x137   : > { %v2615_v6 = vpack.c.bf16 %v1507_v63, %v1507_v63  ;;  %v1227_v8 = vadd.f32 %v2924_v4, %v3394_v3  ;;  %v1221_v10 = vpop.f32.mrb[25].mxu1  ;;  %v902_v13 = vadd.f32 %v3394_v3, %v901_v9 }
 0x138   : > { %v2550_v11 = vpack.c.bf16 %v1442_v0, %v1442_v0  ;;  %v2614_v12 = vpack.c.bf16 %v1506_v1, %v1506_v1  ;;  %v1222_v14 = vadd.f32 %v3394_v3, %v1221_v10  ;;  %2084 = vst.msk [vmem:[%s3404_s15 + $0x5c] sm:$0xf] %vm2060_vm4, %v2551_v5  ;;  %v1445_v15 = vmax.f32 %v907_v7, 0.0 }
 0x139   : > { %2148 = vst.msk [vmem:[%s3404_s15 + $0x15c] sm:$0xf] %vm2060_vm4, %v2615_v6  ;;  %v1509_v16 = vmax.f32 %v1227_v8, 0.0  ;;  %v1444_v17 = vmax.f32 %v902_v13, 0.0  ;;  %v2831_v19 = vpop.f32.mrb[26].mxu0 }
 0x13a   : > { %2083 = vst.msk [vmem:[%s3404_s15 + $0x58] sm:$0xf] %vm2060_vm4, %v2550_v11  ;;  %2147 = vst.msk [vmem:[%s3404_s15 + $0x158] sm:$0xf] %vm2060_vm4, %v2614_v12  ;;  %v1508_v18 = vmax.f32 %v1222_v14, 0.0  ;;  %v2927_v20 = vpop.f32.mrb[26].mxu1  ;;  %v2553_v21 = vpack.c.bf16 %v1445_v15, %v1445_v15  ;;  %v917_v23 = vadd.f32 %v2831_v19, %v3394_v3 }
 0x13b   : > { %v2617_v22 = vpack.c.bf16 %v1509_v16, %v1509_v16  ;;  %v1237_v24 = vadd.f32 %v2927_v20, %v3394_v3  ;;  %v911_v25 = vpop.f32.mrb[27].mxu0  ;;  %v1231_v26 = vpop.f32.mrb[27].mxu1  ;;  %v2552_v27 = vpack.c.bf16 %v1444_v17, %v1444_v17 }
 0x13c   : > { %v2616_v28 = vpack.c.bf16 %v1508_v18, %v1508_v18  ;;  %v912_v29 = vadd.f32 %v3394_v3, %v911_v25  ;;  %v1232_v30 = vadd.f32 %v3394_v3, %v1231_v26  ;;  %2086 = vst.msk [vmem:[%s3404_s15 + $0x64] sm:$0xf] %vm2060_vm4, %v2553_v21  ;;  %v1447_v31 = vmax.f32 %v917_v23, 0.0 }
 0x13d   : > { %2150 = vst.msk [vmem:[%s3404_s15 + $0x164] sm:$0xf] %vm2060_vm4, %v2617_v22  ;;  %v1511_v32 = vmax.f32 %v1237_v24, 0.0  ;;  %2085 = vst.msk [vmem:[%s3404_s15 + $0x60] sm:$0xf] %vm2060_vm4, %v2552_v27  ;;  %v2834_v35 = vpop.f32.mrb[28].mxu0 }
 0x13e   : > { %2149 = vst.msk [vmem:[%s3404_s15 + $0x160] sm:$0xf] %vm2060_vm4, %v2616_v28  ;;  %v1446_v33 = vmax.f32 %v912_v29, 0.0  ;;  %v1510_v34 = vmax.f32 %v1232_v30, 0.0  ;;  %v2930_v36 = vpop.f32.mrb[28].mxu1  ;;  %v2555_v37 = vpack.c.bf16 %v1447_v31, %v1447_v31  ;;  %v927_v39 = vadd.f32 %v2834_v35, %v3394_v3  ;;  %v921_v41 = vpop.f32.mrb[29].mxu0 }
 0x13f   : > { %v2619_v38 = vpack.c.bf16 %v1511_v32, %v1511_v32  ;;  %v1247_v40 = vadd.f32 %v2930_v36, %v3394_v3  ;;  %v1241_v42 = vpop.f32.mrb[29].mxu1  ;;  %v922_v45 = vadd.f32 %v3394_v3, %v921_v41 }
 0x140   : > { %v2554_v43 = vpack.c.bf16 %v1446_v33, %v1446_v33  ;;  %v2618_v44 = vpack.c.bf16 %v1510_v34, %v1510_v34  ;;  %v1242_v46 = vadd.f32 %v3394_v3, %v1241_v42  ;;  %2088 = vst.msk [vmem:[%s3404_s15 + $0x6c] sm:$0xf] %vm2060_vm4, %v2555_v37  ;;  %v1449_v47 = vmax.f32 %v927_v39, 0.0 }
 0x141   : > { %2152 = vst.msk [vmem:[%s3404_s15 + $0x16c] sm:$0xf] %vm2060_vm4, %v2619_v38  ;;  %v1513_v48 = vmax.f32 %v1247_v40, 0.0  ;;  %v1448_v49 = vmax.f32 %v922_v45, 0.0  ;;  %v2837_v51 = vpop.f32.mrb[30].mxu0 }
 0x142   : > { %2087 = vst.msk [vmem:[%s3404_s15 + $0x68] sm:$0xf] %vm2060_vm4, %v2554_v43  ;;  %2151 = vst.msk [vmem:[%s3404_s15 + $0x168] sm:$0xf] %vm2060_vm4, %v2618_v44  ;;  %v1512_v50 = vmax.f32 %v1242_v46, 0.0  ;;  %v2933_v52 = vpop.f32.mrb[30].mxu1  ;;  %v2557_v53 = vpack.c.bf16 %v1449_v47, %v1449_v47  ;;  %v937_v55 = vadd.f32 %v2837_v51, %v3394_v3 }
 0x143   : > { %v2621_v54 = vpack.c.bf16 %v1513_v48, %v1513_v48  ;;  %v1257_v56 = vadd.f32 %v2933_v52, %v3394_v3  ;;  %v931_v57 = vpop.f32.mrb[31].mxu0  ;;  %v1251_v58 = vpop.f32.mrb[31].mxu1  ;;  %v2556_v59 = vpack.c.bf16 %v1448_v49, %v1448_v49 }
 0x144   : > { %v2620_v60 = vpack.c.bf16 %v1512_v50, %v1512_v50  ;;  %v932_v61 = vadd.f32 %v3394_v3, %v931_v57  ;;  %v1252_v62 = vadd.f32 %v3394_v3, %v1251_v58  ;;  %2090 = vst.msk [vmem:[%s3404_s15 + $0x74] sm:$0xf] %vm2060_vm4, %v2557_v53  ;;  %v1451_v63 = vmax.f32 %v937_v55, 0.0 }
 0x145   : > { %2154 = vst.msk [vmem:[%s3404_s15 + $0x174] sm:$0xf] %vm2060_vm4, %v2621_v54  ;;  %v1515_v0 = vmax.f32 %v1257_v56, 0.0  ;;  %2089 = vst.msk [vmem:[%s3404_s15 + $0x70] sm:$0xf] %vm2060_vm4, %v2556_v59  ;;  %v2840_v4 = vpop.f32.mrb[32].mxu0 }
 0x146   : > { %2153 = vst.msk [vmem:[%s3404_s15 + $0x170] sm:$0xf] %vm2060_vm4, %v2620_v60  ;;  %v1450_v1 = vmax.f32 %v932_v61, 0.0  ;;  %v1514_v2 = vmax.f32 %v1252_v62, 0.0  ;;  %v2936_v5 = vpop.f32.mrb[32].mxu1  ;;  %v2559_v6 = vpack.c.bf16 %v1451_v63, %v1451_v63  ;;  %v947_v8 = vadd.f32 %v2840_v4, %v3394_v3  ;;  %v941_v10 = vpop.f32.mrb[33].mxu0 }
 0x147   : > { %v2623_v7 = vpack.c.bf16 %v1515_v0, %v1515_v0  ;;  %v1267_v9 = vadd.f32 %v2936_v5, %v3394_v3  ;;  %v1261_v11 = vpop.f32.mrb[33].mxu1  ;;  %v942_v14 = vadd.f32 %v3394_v3, %v941_v10 }
 0x148   : > { %v2558_v12 = vpack.c.bf16 %v1450_v1, %v1450_v1  ;;  %v2622_v13 = vpack.c.bf16 %v1514_v2, %v1514_v2  ;;  %v1262_v15 = vadd.f32 %v3394_v3, %v1261_v11  ;;  %2092 = vst.msk [vmem:[%s3404_s15 + $0x7c] sm:$0xf] %vm2060_vm4, %v2559_v6  ;;  %v1453_v16 = vmax.f32 %v947_v8, 0.0 }
 0x149   : > { %2156 = vst.msk [vmem:[%s3404_s15 + $0x17c] sm:$0xf] %vm2060_vm4, %v2623_v7  ;;  %v1517_v17 = vmax.f32 %v1267_v9, 0.0  ;;  %v1452_v18 = vmax.f32 %v942_v14, 0.0  ;;  %v2843_v20 = vpop.f32.mrb[34].mxu0 }
 0x14a   : > { %2091 = vst.msk [vmem:[%s3404_s15 + $0x78] sm:$0xf] %vm2060_vm4, %v2558_v12  ;;  %2155 = vst.msk [vmem:[%s3404_s15 + $0x178] sm:$0xf] %vm2060_vm4, %v2622_v13  ;;  %v1516_v19 = vmax.f32 %v1262_v15, 0.0  ;;  %v2939_v21 = vpop.f32.mrb[34].mxu1  ;;  %v2561_v22 = vpack.c.bf16 %v1453_v16, %v1453_v16  ;;  %v957_v24 = vadd.f32 %v2843_v20, %v3394_v3 }
 0x14b   : > { %v2625_v23 = vpack.c.bf16 %v1517_v17, %v1517_v17  ;;  %v1277_v25 = vadd.f32 %v2939_v21, %v3394_v3  ;;  %v951_v26 = vpop.f32.mrb[35].mxu0  ;;  %v1271_v27 = vpop.f32.mrb[35].mxu1  ;;  %v2560_v28 = vpack.c.bf16 %v1452_v18, %v1452_v18 }
 0x14c   : > { %v2624_v29 = vpack.c.bf16 %v1516_v19, %v1516_v19  ;;  %v952_v30 = vadd.f32 %v3394_v3, %v951_v26  ;;  %v1272_v31 = vadd.f32 %v3394_v3, %v1271_v27  ;;  %2094 = vst.msk [vmem:[%s3404_s15 + $0x84] sm:$0xf] %vm2060_vm4, %v2561_v22  ;;  %v1455_v32 = vmax.f32 %v957_v24, 0.0 }
 0x14d   : > { %2158 = vst.msk [vmem:[%s3404_s15 + $0x184] sm:$0xf] %vm2060_vm4, %v2625_v23  ;;  %v1519_v33 = vmax.f32 %v1277_v25, 0.0  ;;  %2093 = vst.msk [vmem:[%s3404_s15 + $0x80] sm:$0xf] %vm2060_vm4, %v2560_v28  ;;  %v2846_v36 = vpop.f32.mrb[36].mxu0 }
 0x14e   : > { %2157 = vst.msk [vmem:[%s3404_s15 + $0x180] sm:$0xf] %vm2060_vm4, %v2624_v29  ;;  %v1454_v34 = vmax.f32 %v952_v30, 0.0  ;;  %v1518_v35 = vmax.f32 %v1272_v31, 0.0  ;;  %v2942_v37 = vpop.f32.mrb[36].mxu1  ;;  %v2563_v38 = vpack.c.bf16 %v1455_v32, %v1455_v32  ;;  %v967_v40 = vadd.f32 %v2846_v36, %v3394_v3  ;;  %v961_v42 = vpop.f32.mrb[37].mxu0 }
 0x14f   : > { %v2627_v39 = vpack.c.bf16 %v1519_v33, %v1519_v33  ;;  %v1287_v41 = vadd.f32 %v2942_v37, %v3394_v3  ;;  %v1281_v43 = vpop.f32.mrb[37].mxu1  ;;  %v962_v46 = vadd.f32 %v3394_v3, %v961_v42 }
 0x150   : > { %v2562_v44 = vpack.c.bf16 %v1454_v34, %v1454_v34  ;;  %v2626_v45 = vpack.c.bf16 %v1518_v35, %v1518_v35  ;;  %v1282_v47 = vadd.f32 %v3394_v3, %v1281_v43  ;;  %2096 = vst.msk [vmem:[%s3404_s15 + $0x8c] sm:$0xf] %vm2060_vm4, %v2563_v38  ;;  %v1457_v48 = vmax.f32 %v967_v40, 0.0 }
 0x151   : > { %2160 = vst.msk [vmem:[%s3404_s15 + $0x18c] sm:$0xf] %vm2060_vm4, %v2627_v39  ;;  %v1521_v49 = vmax.f32 %v1287_v41, 0.0  ;;  %v1456_v50 = vmax.f32 %v962_v46, 0.0  ;;  %v2849_v52 = vpop.f32.mrb[38].mxu0 }
 0x152   : > { %2095 = vst.msk [vmem:[%s3404_s15 + $0x88] sm:$0xf] %vm2060_vm4, %v2562_v44  ;;  %2159 = vst.msk [vmem:[%s3404_s15 + $0x188] sm:$0xf] %vm2060_vm4, %v2626_v45  ;;  %v1520_v51 = vmax.f32 %v1282_v47, 0.0  ;;  %v2945_v53 = vpop.f32.mrb[38].mxu1  ;;  %v2565_v54 = vpack.c.bf16 %v1457_v48, %v1457_v48  ;;  %v977_v56 = vadd.f32 %v2849_v52, %v3394_v3 }
 0x153   : > { %v2629_v55 = vpack.c.bf16 %v1521_v49, %v1521_v49  ;;  %v1297_v57 = vadd.f32 %v2945_v53, %v3394_v3  ;;  %v971_v58 = vpop.f32.mrb[39].mxu0  ;;  %v1291_v59 = vpop.f32.mrb[39].mxu1  ;;  %v2564_v60 = vpack.c.bf16 %v1456_v50, %v1456_v50 }
 0x154   : > { %v2628_v61 = vpack.c.bf16 %v1520_v51, %v1520_v51  ;;  %v972_v62 = vadd.f32 %v3394_v3, %v971_v58  ;;  %v1292_v63 = vadd.f32 %v3394_v3, %v1291_v59  ;;  %2098 = vst.msk [vmem:[%s3404_s15 + $0x94] sm:$0xf] %vm2060_vm4, %v2565_v54  ;;  %v1459_v0 = vmax.f32 %v977_v56, 0.0 }
 0x155   : > { %2162 = vst.msk [vmem:[%s3404_s15 + $0x194] sm:$0xf] %vm2060_vm4, %v2629_v55  ;;  %v1523_v1 = vmax.f32 %v1297_v57, 0.0  ;;  %2097 = vst.msk [vmem:[%s3404_s15 + $0x90] sm:$0xf] %vm2060_vm4, %v2564_v60  ;;  %v2852_v5 = vpop.f32.mrb[40].mxu0 }
 0x156   : > { %2161 = vst.msk [vmem:[%s3404_s15 + $0x190] sm:$0xf] %vm2060_vm4, %v2628_v61  ;;  %v1458_v2 = vmax.f32 %v972_v62, 0.0  ;;  %v1522_v4 = vmax.f32 %v1292_v63, 0.0  ;;  %v2948_v6 = vpop.f32.mrb[40].mxu1  ;;  %v2567_v7 = vpack.c.bf16 %v1459_v0, %v1459_v0  ;;  %v987_v9 = vadd.f32 %v2852_v5, %v3394_v3  ;;  %v981_v11 = vpop.f32.mrb[41].mxu0 }
 0x157   : > { %v2631_v8 = vpack.c.bf16 %v1523_v1, %v1523_v1  ;;  %v1307_v10 = vadd.f32 %v2948_v6, %v3394_v3  ;;  %v1301_v12 = vpop.f32.mrb[41].mxu1  ;;  %v982_v15 = vadd.f32 %v3394_v3, %v981_v11 }
 0x158   : > { %v2566_v13 = vpack.c.bf16 %v1458_v2, %v1458_v2  ;;  %v2630_v14 = vpack.c.bf16 %v1522_v4, %v1522_v4  ;;  %v1302_v16 = vadd.f32 %v3394_v3, %v1301_v12  ;;  %2100 = vst.msk [vmem:[%s3404_s15 + $0x9c] sm:$0xf] %vm2060_vm4, %v2567_v7  ;;  %v1461_v17 = vmax.f32 %v987_v9, 0.0 }
 0x159   : > { %2164 = vst.msk [vmem:[%s3404_s15 + $0x19c] sm:$0xf] %vm2060_vm4, %v2631_v8  ;;  %v1525_v18 = vmax.f32 %v1307_v10, 0.0  ;;  %v1460_v19 = vmax.f32 %v982_v15, 0.0  ;;  %v2855_v21 = vpop.f32.mrb[42].mxu0 }
 0x15a   : > { %2099 = vst.msk [vmem:[%s3404_s15 + $0x98] sm:$0xf] %vm2060_vm4, %v2566_v13  ;;  %2163 = vst.msk [vmem:[%s3404_s15 + $0x198] sm:$0xf] %vm2060_vm4, %v2630_v14  ;;  %v1524_v20 = vmax.f32 %v1302_v16, 0.0  ;;  %v2951_v22 = vpop.f32.mrb[42].mxu1  ;;  %v2569_v23 = vpack.c.bf16 %v1461_v17, %v1461_v17  ;;  %v997_v25 = vadd.f32 %v2855_v21, %v3394_v3 }
 0x15b   : > { %v2633_v24 = vpack.c.bf16 %v1525_v18, %v1525_v18  ;;  %v1317_v26 = vadd.f32 %v2951_v22, %v3394_v3  ;;  %v991_v27 = vpop.f32.mrb[43].mxu0  ;;  %v1311_v28 = vpop.f32.mrb[43].mxu1  ;;  %v2568_v29 = vpack.c.bf16 %v1460_v19, %v1460_v19 }
 0x15c   : > { %v2632_v30 = vpack.c.bf16 %v1524_v20, %v1524_v20  ;;  %v992_v31 = vadd.f32 %v3394_v3, %v991_v27  ;;  %v1312_v32 = vadd.f32 %v3394_v3, %v1311_v28  ;;  %2102 = vst.msk [vmem:[%s3404_s15 + $0xa4] sm:$0xf] %vm2060_vm4, %v2569_v23  ;;  %v1463_v33 = vmax.f32 %v997_v25, 0.0 }
 0x15d   : > { %2166 = vst.msk [vmem:[%s3404_s15 + $0x1a4] sm:$0xf] %vm2060_vm4, %v2633_v24  ;;  %v1527_v34 = vmax.f32 %v1317_v26, 0.0  ;;  %2101 = vst.msk [vmem:[%s3404_s15 + $0xa0] sm:$0xf] %vm2060_vm4, %v2568_v29  ;;  %v2858_v37 = vpop.f32.mrb[44].mxu0 }
 0x15e   : > { %2165 = vst.msk [vmem:[%s3404_s15 + $0x1a0] sm:$0xf] %vm2060_vm4, %v2632_v30  ;;  %v1462_v35 = vmax.f32 %v992_v31, 0.0  ;;  %v1526_v36 = vmax.f32 %v1312_v32, 0.0  ;;  %v2954_v38 = vpop.f32.mrb[44].mxu1  ;;  %v2571_v39 = vpack.c.bf16 %v1463_v33, %v1463_v33  ;;  %v1007_v41 = vadd.f32 %v2858_v37, %v3394_v3  ;;  %v1001_v43 = vpop.f32.mrb[45].mxu0 }
 0x15f   : > { %v2635_v40 = vpack.c.bf16 %v1527_v34, %v1527_v34  ;;  %v1327_v42 = vadd.f32 %v2954_v38, %v3394_v3  ;;  %v1321_v44 = vpop.f32.mrb[45].mxu1  ;;  %v1002_v47 = vadd.f32 %v3394_v3, %v1001_v43 }
 0x160   : > { %v2570_v45 = vpack.c.bf16 %v1462_v35, %v1462_v35  ;;  %v2634_v46 = vpack.c.bf16 %v1526_v36, %v1526_v36  ;;  %v1322_v48 = vadd.f32 %v3394_v3, %v1321_v44  ;;  %2104 = vst.msk [vmem:[%s3404_s15 + $0xac] sm:$0xf] %vm2060_vm4, %v2571_v39  ;;  %v1465_v49 = vmax.f32 %v1007_v41, 0.0  ;;  %v3709_v41 = vld [vmem:[%s3796_s2] ss:$0 sm:$0xff] }
 0x161   : > { %2168 = vst.msk [vmem:[%s3404_s15 + $0x1ac] sm:$0xf] %vm2060_vm4, %v2635_v40  ;;  %v1529_v50 = vmax.f32 %v1327_v42, 0.0  ;;  %v1464_v51 = vmax.f32 %v1002_v47, 0.0  ;;  %v2861_v53 = vpop.f32.mrb[46].mxu0 }
 0x162   : > { %2103 = vst.msk [vmem:[%s3404_s15 + $0xa8] sm:$0xf] %vm2060_vm4, %v2570_v45  ;;  %2167 = vst.msk [vmem:[%s3404_s15 + $0x1a8] sm:$0xf] %vm2060_vm4, %v2634_v46  ;;  %v1528_v52 = vmax.f32 %v1322_v48, 0.0  ;;  %v2957_v54 = vpop.f32.mrb[46].mxu1  ;;  %v2573_v55 = vpack.c.bf16 %v1465_v49, %v1465_v49  ;;  %v1017_v57 = vadd.f32 %v2861_v53, %v3394_v3 }
 0x163   : > { %v2637_v56 = vpack.c.bf16 %v1529_v50, %v1529_v50  ;;  %v1337_v58 = vadd.f32 %v2957_v54, %v3394_v3  ;;  %v1011_v59 = vpop.f32.mrb[47].mxu0  ;;  %v1331_v60 = vpop.f32.mrb[47].mxu1  ;;  %v2572_v61 = vpack.c.bf16 %v1464_v51, %v1464_v51 }
 0x164   : > { %v2636_v62 = vpack.c.bf16 %v1528_v52, %v1528_v52  ;;  %v1012_v63 = vadd.f32 %v3394_v3, %v1011_v59  ;;  %v1332_v0 = vadd.f32 %v3394_v3, %v1331_v60  ;;  %2106 = vst.msk [vmem:[%s3404_s15 + $0xb4] sm:$0xf] %vm2060_vm4, %v2573_v55  ;;  %v1467_v1 = vmax.f32 %v1017_v57, 0.0 }
 0x165   : > { %2170 = vst.msk [vmem:[%s3404_s15 + $0x1b4] sm:$0xf] %vm2060_vm4, %v2637_v56  ;;  %v1531_v2 = vmax.f32 %v1337_v58, 0.0  ;;  %2105 = vst.msk [vmem:[%s3404_s15 + $0xb0] sm:$0xf] %vm2060_vm4, %v2572_v61  ;;  %v2864_v6 = vpop.f32.mrb[48].mxu0 }
 0x166   : > { %2169 = vst.msk [vmem:[%s3404_s15 + $0x1b0] sm:$0xf] %vm2060_vm4, %v2636_v62  ;;  %v1466_v4 = vmax.f32 %v1012_v63, 0.0  ;;  %v1530_v5 = vmax.f32 %v1332_v0, 0.0  ;;  %v2960_v7 = vpop.f32.mrb[48].mxu1  ;;  %v2575_v8 = vpack.c.bf16 %v1467_v1, %v1467_v1  ;;  %v1027_v10 = vadd.f32 %v2864_v6, %v3394_v3  ;;  %v1021_v12 = vpop.f32.mrb[49].mxu0 }
 0x167   : > { %v2639_v9 = vpack.c.bf16 %v1531_v2, %v1531_v2  ;;  %v1347_v11 = vadd.f32 %v2960_v7, %v3394_v3  ;;  %v1341_v13 = vpop.f32.mrb[49].mxu1  ;;  %v1022_v16 = vadd.f32 %v3394_v3, %v1021_v12 }
 0x168   : > { %v2574_v14 = vpack.c.bf16 %v1466_v4, %v1466_v4  ;;  %v2638_v15 = vpack.c.bf16 %v1530_v5, %v1530_v5  ;;  %v1342_v17 = vadd.f32 %v3394_v3, %v1341_v13  ;;  %2108 = vst.msk [vmem:[%s3404_s15 + $0xbc] sm:$0xf] %vm2060_vm4, %v2575_v8  ;;  %v1469_v18 = vmax.f32 %v1027_v10, 0.0 }
 0x169   : > { %2172 = vst.msk [vmem:[%s3404_s15 + $0x1bc] sm:$0xf] %vm2060_vm4, %v2639_v9  ;;  %v1533_v19 = vmax.f32 %v1347_v11, 0.0  ;;  %v1468_v20 = vmax.f32 %v1022_v16, 0.0  ;;  %v2867_v22 = vpop.f32.mrb[50].mxu0 }
 0x16a   : > { %2107 = vst.msk [vmem:[%s3404_s15 + $0xb8] sm:$0xf] %vm2060_vm4, %v2574_v14  ;;  %2171 = vst.msk [vmem:[%s3404_s15 + $0x1b8] sm:$0xf] %vm2060_vm4, %v2638_v15  ;;  %v1532_v21 = vmax.f32 %v1342_v17, 0.0  ;;  %v2963_v23 = vpop.f32.mrb[50].mxu1  ;;  %v2577_v24 = vpack.c.bf16 %v1469_v18, %v1469_v18  ;;  %v1037_v26 = vadd.f32 %v2867_v22, %v3394_v3 }
 0x16b   : > { %v2641_v25 = vpack.c.bf16 %v1533_v19, %v1533_v19  ;;  %v1357_v27 = vadd.f32 %v2963_v23, %v3394_v3  ;;  %v1031_v28 = vpop.f32.mrb[51].mxu0  ;;  %v1351_v29 = vpop.f32.mrb[51].mxu1  ;;  %v2576_v30 = vpack.c.bf16 %v1468_v20, %v1468_v20 }
 0x16c   : > { %v2640_v31 = vpack.c.bf16 %v1532_v21, %v1532_v21  ;;  %v1032_v32 = vadd.f32 %v3394_v3, %v1031_v28  ;;  %v1352_v33 = vadd.f32 %v3394_v3, %v1351_v29  ;;  %2110 = vst.msk [vmem:[%s3404_s15 + $0xc4] sm:$0xf] %vm2060_vm4, %v2577_v24  ;;  %v1471_v34 = vmax.f32 %v1037_v26, 0.0 }
 0x16d   : > { %2174 = vst.msk [vmem:[%s3404_s15 + $0x1c4] sm:$0xf] %vm2060_vm4, %v2641_v25  ;;  %v1535_v35 = vmax.f32 %v1357_v27, 0.0  ;;  %2109 = vst.msk [vmem:[%s3404_s15 + $0xc0] sm:$0xf] %vm2060_vm4, %v2576_v30  ;;  %v2870_v38 = vpop.f32.mrb[52].mxu0 }
 0x16e   : > { %2173 = vst.msk [vmem:[%s3404_s15 + $0x1c0] sm:$0xf] %vm2060_vm4, %v2640_v31  ;;  %v1470_v36 = vmax.f32 %v1032_v32, 0.0  ;;  %v1534_v37 = vmax.f32 %v1352_v33, 0.0  ;;  %v2966_v39 = vpop.f32.mrb[52].mxu1  ;;  %v2579_v40 = vpack.c.bf16 %v1471_v34, %v1471_v34  ;;  %v1047_v42 = vadd.f32 %v3709_v41, %v2870_v38  ;;  %v1041_v44 = vpop.f32.mrb[53].mxu0 }
 0x16f   : > { %v2643_v3 = vpack.c.bf16 %v1535_v35, %v1535_v35  ;;  %v1367_v43 = vadd.f32 %v3709_v41, %v2966_v39  ;;  %v1361_v45 = vpop.f32.mrb[53].mxu1  ;;  %v1042_v48 = vadd.f32 %v3709_v41, %v1041_v44 }
 0x170   : > { %v2578_v46 = vpack.c.bf16 %v1470_v36, %v1470_v36  ;;  %v2642_v47 = vpack.c.bf16 %v1534_v37, %v1534_v37  ;;  %v1362_v49 = vadd.f32 %v3709_v41, %v1361_v45  ;;  %2112 = vst.msk [vmem:[%s3404_s15 + $0xcc] sm:$0xf] %vm2060_vm4, %v2579_v40  ;;  %v1473_v50 = vmax.f32 %v1047_v42, 0.0 }
 0x171   : > { %2176 = vst.msk [vmem:[%s3404_s15 + $0x1cc] sm:$0xf] %vm2060_vm4, %v2643_v3  ;;  %v1537_v51 = vmax.f32 %v1367_v43, 0.0  ;;  %v1472_v52 = vmax.f32 %v1042_v48, 0.0  ;;  %v2873_v54 = vpop.f32.mrb[54].mxu0 }
 0x172   : > { %2111 = vst.msk [vmem:[%s3404_s15 + $0xc8] sm:$0xf] %vm2060_vm4, %v2578_v46  ;;  %2175 = vst.msk [vmem:[%s3404_s15 + $0x1c8] sm:$0xf] %vm2060_vm4, %v2642_v47  ;;  %v1536_v53 = vmax.f32 %v1362_v49, 0.0  ;;  %v2969_v55 = vpop.f32.mrb[54].mxu1  ;;  %v2581_v56 = vpack.c.bf16 %v1473_v50, %v1473_v50  ;;  %v1057_v58 = vadd.f32 %v3709_v41, %v2873_v54 }
 0x173   : > { %v2645_v57 = vpack.c.bf16 %v1537_v51, %v1537_v51  ;;  %v1377_v59 = vadd.f32 %v3709_v41, %v2969_v55  ;;  %v1051_v60 = vpop.f32.mrb[55].mxu0  ;;  %v1371_v61 = vpop.f32.mrb[55].mxu1  ;;  %v2580_v62 = vpack.c.bf16 %v1472_v52, %v1472_v52 }
 0x174   : > { %v2644_v63 = vpack.c.bf16 %v1536_v53, %v1536_v53  ;;  %v1052_v0 = vadd.f32 %v3709_v41, %v1051_v60  ;;  %v1372_v1 = vadd.f32 %v3709_v41, %v1371_v61  ;;  %2114 = vst.msk [vmem:[%s3404_s15 + $0xd4] sm:$0xf] %vm2060_vm4, %v2581_v56  ;;  %v1475_v2 = vmax.f32 %v1057_v58, 0.0 }
 0x175   : > { %2178 = vst.msk [vmem:[%s3404_s15 + $0x1d4] sm:$0xf] %vm2060_vm4, %v2645_v57  ;;  %v1539_v4 = vmax.f32 %v1377_v59, 0.0  ;;  %2113 = vst.msk [vmem:[%s3404_s15 + $0xd0] sm:$0xf] %vm2060_vm4, %v2580_v62  ;;  %v2876_v7 = vpop.f32.mrb[56].mxu0 }
 0x176   : > { %2177 = vst.msk [vmem:[%s3404_s15 + $0x1d0] sm:$0xf] %vm2060_vm4, %v2644_v63  ;;  %v1474_v5 = vmax.f32 %v1052_v0, 0.0  ;;  %v1538_v6 = vmax.f32 %v1372_v1, 0.0  ;;  %v2972_v8 = vpop.f32.mrb[56].mxu1  ;;  %v2583_v9 = vpack.c.bf16 %v1475_v2, %v1475_v2  ;;  %v1067_v11 = vadd.f32 %v3709_v41, %v2876_v7  ;;  %v1061_v13 = vpop.f32.mrb[57].mxu0 }
 0x177   : > { %v2647_v10 = vpack.c.bf16 %v1539_v4, %v1539_v4  ;;  %v1387_v12 = vadd.f32 %v3709_v41, %v2972_v8  ;;  %v1381_v14 = vpop.f32.mrb[57].mxu1  ;;  %v1062_v17 = vadd.f32 %v3709_v41, %v1061_v13 }
 0x178   : > { %v2582_v15 = vpack.c.bf16 %v1474_v5, %v1474_v5  ;;  %v2646_v16 = vpack.c.bf16 %v1538_v6, %v1538_v6  ;;  %v1382_v18 = vadd.f32 %v3709_v41, %v1381_v14  ;;  %2116 = vst.msk [vmem:[%s3404_s15 + $0xdc] sm:$0xf] %vm2060_vm4, %v2583_v9  ;;  %v1477_v19 = vmax.f32 %v1067_v11, 0.0 }
 0x179   : > { %2180 = vst.msk [vmem:[%s3404_s15 + $0x1dc] sm:$0xf] %vm2060_vm4, %v2647_v10  ;;  %v1541_v20 = vmax.f32 %v1387_v12, 0.0  ;;  %v1476_v21 = vmax.f32 %v1062_v17, 0.0  ;;  %v2879_v23 = vpop.f32.mrb[58].mxu0 }
 0x17a   : > { %2115 = vst.msk [vmem:[%s3404_s15 + $0xd8] sm:$0xf] %vm2060_vm4, %v2582_v15  ;;  %2179 = vst.msk [vmem:[%s3404_s15 + $0x1d8] sm:$0xf] %vm2060_vm4, %v2646_v16  ;;  %v1540_v22 = vmax.f32 %v1382_v18, 0.0  ;;  %v2975_v24 = vpop.f32.mrb[58].mxu1  ;;  %v2585_v25 = vpack.c.bf16 %v1477_v19, %v1477_v19  ;;  %v1077_v27 = vadd.f32 %v3709_v41, %v2879_v23 }
 0x17b   : > { %v2649_v26 = vpack.c.bf16 %v1541_v20, %v1541_v20  ;;  %v1397_v28 = vadd.f32 %v3709_v41, %v2975_v24  ;;  %v1071_v29 = vpop.f32.mrb[59].mxu0  ;;  %v1391_v30 = vpop.f32.mrb[59].mxu1  ;;  %v2584_v31 = vpack.c.bf16 %v1476_v21, %v1476_v21 }
 0x17c   : > { %v2648_v32 = vpack.c.bf16 %v1540_v22, %v1540_v22  ;;  %v1072_v33 = vadd.f32 %v3709_v41, %v1071_v29  ;;  %v1392_v34 = vadd.f32 %v3709_v41, %v1391_v30  ;;  %2118 = vst.msk [vmem:[%s3404_s15 + $0xe4] sm:$0xf] %vm2060_vm4, %v2585_v25  ;;  %v1479_v35 = vmax.f32 %v1077_v27, 0.0 }
 0x17d   : > { %2182 = vst.msk [vmem:[%s3404_s15 + $0x1e4] sm:$0xf] %vm2060_vm4, %v2649_v26  ;;  %v1543_v36 = vmax.f32 %v1397_v28, 0.0  ;;  %2117 = vst.msk [vmem:[%s3404_s15 + $0xe0] sm:$0xf] %vm2060_vm4, %v2584_v31  ;;  %v2882_v39 = vpop.f32.mrb[60].mxu0 }
 0x17e   : > { %2181 = vst.msk [vmem:[%s3404_s15 + $0x1e0] sm:$0xf] %vm2060_vm4, %v2648_v32  ;;  %v1478_v37 = vmax.f32 %v1072_v33, 0.0  ;;  %v1542_v38 = vmax.f32 %v1392_v34, 0.0  ;;  %v2978_v40 = vpop.f32.mrb[60].mxu1  ;;  %v2587_v3 = vpack.c.bf16 %v1479_v35, %v1479_v35  ;;  %v1087_v43 = vadd.f32 %v3709_v41, %v2882_v39  ;;  %v1081_v45 = vpop.f32.mrb[61].mxu0 }
 0x17f   : > { %v2651_v42 = vpack.c.bf16 %v1543_v36, %v1543_v36  ;;  %v1407_v44 = vadd.f32 %v3709_v41, %v2978_v40  ;;  %v1401_v46 = vpop.f32.mrb[61].mxu1  ;;  %v1082_v49 = vadd.f32 %v3709_v41, %v1081_v45 }
 0x180   : > { %v2586_v47 = vpack.c.bf16 %v1478_v37, %v1478_v37  ;;  %v2650_v48 = vpack.c.bf16 %v1542_v38, %v1542_v38  ;;  %v1402_v50 = vadd.f32 %v3709_v41, %v1401_v46  ;;  %2120 = vst.msk [vmem:[%s3404_s15 + $0xec] sm:$0xf] %vm2060_vm4, %v2587_v3  ;;  %v1481_v51 = vmax.f32 %v1087_v43, 0.0 }
 0x181   : > { %2184 = vst.msk [vmem:[%s3404_s15 + $0x1ec] sm:$0xf] %vm2060_vm4, %v2651_v42  ;;  %v1545_v52 = vmax.f32 %v1407_v44, 0.0  ;;  %v1480_v53 = vmax.f32 %v1082_v49, 0.0  ;;  %v2885_v55 = vpop.f32.mrb[62].mxu0 }
 0x182   : > { %2119 = vst.msk [vmem:[%s3404_s15 + $0xe8] sm:$0xf] %vm2060_vm4, %v2586_v47  ;;  %2183 = vst.msk [vmem:[%s3404_s15 + $0x1e8] sm:$0xf] %vm2060_vm4, %v2650_v48  ;;  %v1544_v54 = vmax.f32 %v1402_v50, 0.0  ;;  %v2981_v56 = vpop.f32.mrb[62].mxu1  ;;  %v2589_v57 = vpack.c.bf16 %v1481_v51, %v1481_v51  ;;  %v1097_v59 = vadd.f32 %v3709_v41, %v2885_v55 }
 0x183   : > { %v2653_v58 = vpack.c.bf16 %v1545_v52, %v1545_v52  ;;  %v1417_v60 = vadd.f32 %v3709_v41, %v2981_v56  ;;  %v1091_v61 = vpop.f32.mrb[63].mxu0  ;;  %v1411_v62 = vpop.f32.mrb[63].mxu1  ;;  %v2588_v63 = vpack.c.bf16 %v1480_v53, %v1480_v53 }
 0x184   : > { %v2652_v0 = vpack.c.bf16 %v1544_v54, %v1544_v54  ;;  %v1092_v1 = vadd.f32 %v3709_v41, %v1091_v61  ;;  %v1412_v2 = vadd.f32 %v3709_v41, %v1411_v62  ;;  %2122 = vst.msk [vmem:[%s3404_s15 + $0xf4] sm:$0xf] %vm2060_vm4, %v2589_v57  ;;  %v1483_v4 = vmax.f32 %v1097_v59, 0.0 }
 0x185   : > { %2186 = vst.msk [vmem:[%s3404_s15 + $0x1f4] sm:$0xf] %vm2060_vm4, %v2653_v58  ;;  %v1547_v5 = vmax.f32 %v1417_v60, 0.0  ;;  %2121 = vst.msk [vmem:[%s3404_s15 + $0xf0] sm:$0xf] %vm2060_vm4, %v2588_v63 }
 0x186   : > { %2185 = vst.msk [vmem:[%s3404_s15 + $0x1f0] sm:$0xf] %vm2060_vm4, %v2652_v0  ;;  %v1482_v6 = vmax.f32 %v1092_v1, 0.0  ;;  %v1546_v7 = vmax.f32 %v1412_v2, 0.0  ;;  %v2591_v8 = vpack.c.bf16 %v1483_v4, %v1483_v4 }
 0x187   : > { %v2655_v9 = vpack.c.bf16 %v1547_v5, %v1547_v5 }
 0x188   : > { %v2590_v10 = vpack.c.bf16 %v1482_v6, %v1482_v6  ;;  %v2654_v11 = vpack.c.bf16 %v1546_v7, %v1546_v7  ;;  %2124 = vst.msk [vmem:[%s3404_s15 + $0xfc] sm:$0xf] %vm2060_vm4, %v2591_v8 }
 0x189   : > { %2188 = vst.msk [vmem:[%s3404_s15 + $0x1fc] sm:$0xf] %vm2060_vm4, %v2655_v9 }
 0x18a   : > { %2123 = vst.msk [vmem:[%s3404_s15 + $0xf8] sm:$0xf] %vm2060_vm4, %v2590_v10  ;;  %2187 = vst.msk [vmem:[%s3404_s15 + $0x1f8] sm:$0xf] %vm2060_vm4, %v2654_v11 }
 0x18b PF: > { %s14_s12 = sadd.s32 1, %s3051_s12  }
 0x18c   : > { %p11_p3 = scmp.ge.s32.totalorder %s14_s12, 4  }
 0x18e   :  { %13 = sbr.rel (!%p11_p3) target bundleno = 1 (0x1), region = 67 }
 0x195   :  { %2211 = vsyncpa [#allocation3], 1 }
 0x196   :  { %2213 = vsyncpa [#allocation3 + $0x1], 1 }

// kernel: unique_eq2_net_forward.4
= control target key start
LH: loop header
LB: loop body
LE: loop exit
PB: predicated region body
PF: predicated region fallthrough
CT: control target
= control target key end

     0   :  { %s1131_s18 = smov 0   ;;  %s1351_s0 = inlined_call_operand.vmem [shape: bf16[2048,144], index: 0, kind: input, shape index: {}]   ;;  %s1352_s1 = inlined_call_operand.vmem [shape: bf16[144,16], index: 1, kind: input, shape index: {}]   ;;  %s1353_s2 = inlined_call_operand.vmem [shape: f32[1,16], index: 2, kind: input, shape index: {}, may-alias: {2,4}]   ;;  %s1354_s3 = inlined_call_operand.vmem [shape: f32[16,16], index: 3, kind: input, shape index: {}]   ;;  %s1355_s4 = inlined_call_operand.vmem [shape: f32[1,16], index: 4, kind: input, shape index: {}, may-alias: {2,4}]   ;;  %s1356_s5 = inlined_call_operand.vmem [shape: f32[8,1,16], index: 5, kind: output, shape index: {}]  }
   0x1 LB: > { %s1137_s19 = sadd.s32 4294967295, %s1095_s18   ;;  %p923_p0 = scmp.ge.s32.totalorder %s1095_s18, 1  ;;  %s1095_s18 = sphi %s1131_s18, %s15_s18  }
   0x2   : > { %p189_p1 = scmp.lt.s32.totalorder %s1095_s18, 9 }
   0x4   : > { %p190_p2 = pnand %p923_p0, %p189_p1 }
   0x5   : > { %v1032_v0 = vld [vmem:[%s1352_s1] sm:$0xff] (!%p190_p2)   ;;  %v1097_v1 = vmov (!%p190_p2), 0   ;;  %s924_s22 = sshll.u32 (!%p190_p2), %s1137_s19, 5  ;;  %v1033_v2 = vld [vmem:[%s1352_s1 + $0x8] sm:$0xff] (!%p190_p2)   ;;  %v1034_v3 = vld [vmem:[%s1352_s1 + $0x10] sm:$0xff] (!%p190_p2)   ;;  %vm482_vm0 = vcmask (!%p190_p2), 130048  }
   0x6   : > { %193 = sbr.rel (%p190_p2) target bundleno = 584 (0x248), region = 40  ;;  %531 = vmatprep.subr.bf16.mxu0 (!%p190_p2), %v1097_v1  ;;  %1002 = vmatprep.subr.bf16.mxu1 (!%p190_p2), %v1097_v1  ;;  %p217_p3 = scmp.lt.s32.totalorder (!%p190_p2), %s924_s22, 255  ;;  %v1035_v4 = vld [vmem:[%s1352_s1 + $0x18] sm:$0xff] (!%p190_p2)   ;;  %v1036_v6 = vld [vmem:[%s1352_s1 + $0x20] sm:$0xff] (!%p190_p2)   ;;  %v1037_v7 = vld [vmem:[%s1352_s1 + $0x28] sm:$0xff] (!%p190_p2)   ;;  %v1098_v44 = vmov (!%p190_p2), 0.0|0.0  }
   0x7   : > { %532 = vmatpush1.bf16.msra.mxu0 (!%p190_p2), %v1032_v0  ;;  %1011 = vmatpush1.bf16.msra.mxu1 (!%p190_p2), %v1032_v0  ;;  %v1038_v9 = vld [vmem:[%s1352_s1 + $0x30] sm:$0xff] (!%p190_p2)   ;;  %v1039_v10 = vld [vmem:[%s1352_s1 + $0x38] sm:$0xff] (!%p190_p2)   ;;  %v1040_v11 = vld [vmem:[%s1352_s1 + $0x40] sm:$0xff] (!%p190_p2)   ;;  %vm1099_vm1 = vmmov (!%p190_p2), 0   ;;  %v1100_v46 = vmov (!%p190_p2), 0.0   ;;  %p223_p4 = scmp.lt.s32.totalorder (!%p190_p2), %s1137_s19, 7 }
   0x8   : > { %533 = vmatprep.subr.bf16.mxu0 (!%p190_p2), %v1097_v1  ;;  %1003 = vmatprep.subr.bf16.mxu1 (!%p190_p2), %v1097_v1  ;;  %v794_v42 = vld [vmem:[%s1354_s3] sm:$0xff] (!%p190_p2)  ;;  %v795_v43 = vld [vmem:[%s1354_s3 + $0x8] sm:$0xff] (!%p190_p2)  ;;  %vm870_vm2 = vcmask (!%p190_p2), 122880  }
   0x9   : > { %v1000_v45 = vpack.c.bf16 (!%p190_p2), %v795_v43, %v794_v42  ;;  %v1231_v47 = vld [vmem:[%s1353_s2] ss:$0 sm:$0xff] (!%p190_p2) }
   0xb   : > { %534 = vmatpush1.bf16.msra.mxu0 (!%p190_p2), %v1033_v2  ;;  %1012 = vmatpush1.bf16.msra.mxu1 (!%p190_p2), %v1033_v2 }
   0xc   : > { %535 = vmatprep.subr.bf16.mxu0 (!%p190_p2), %v1097_v1  ;;  %1004 = vmatprep.subr.bf16.mxu1 (!%p190_p2), %v1097_v1 }
   0xd   : > { %s1358_s22 = smov (!%p217_p3, %s924_s22), 255  ;;  %s1360_s19 = smov (!%p223_p4, %s1137_s19), 7 }
   0xe   : > { %s988_s27 = sshll.u32 %s1358_s22, 3 }
   0xf   : > { %s1154_s30 = scalar_lea.vmem %s1351_s0, %s988_s27  ;;  %536 = vmatpush1.bf16.msra.mxu0 %v1034_v3  ;;  %1013 = vmatpush1.bf16.msra.mxu1 %v1034_v3 }
  0x10   : > { %v1043_v5 = vld [vmem:[%s1154_s30 + $0x4] ss:$8 sps:$4 sm:$0xff]   ;;  %537 = vmatprep.subr.bf16.mxu0 %v1097_v1  ;;  %1005 = vmatprep.subr.bf16.mxu1 %v1097_v1  ;;  %v1061_v8 = vld [vmem:[%s1154_s30 + $0x94] ss:$8 sps:$4 sm:$0xff]   ;;  %v1041_v12 = vld [vmem:[%s1154_s30] ss:$8 sps:$4 sm:$0xff]  }
  0x11   : > { %969 = vmatprep.mubr.msk.bf16.mxu0 %vm482_vm0, %v1043_v5  ;;  %978 = vmatprep.mubr.msk.bf16.mxu1 %vm482_vm0, %v1061_v8  ;;  %v1059_v13 = vld [vmem:[%s1154_s30 + $0x90] ss:$8 sps:$4 sm:$0xff]   ;;  %v1044_v14 = vld [vmem:[%s1154_s30 + $0x14] ss:$8 sps:$4 sm:$0xff]   ;;  %v1065_v15 = vld [vmem:[%s1154_s30 + $0xa4] ss:$8 sps:$4 sm:$0xff]  }
  0x12   : > { %v1046_v16 = vld [vmem:[%s1154_s30 + $0x10] ss:$8 sps:$4 sm:$0xff]   ;;  %v1067_v17 = vld [vmem:[%s1154_s30 + $0xa0] ss:$8 sps:$4 sm:$0xff]   ;;  %v1047_v18 = vld [vmem:[%s1154_s30 + $0x24] ss:$8 sps:$4 sm:$0xff]  }
  0x13   : > { %538 = vmatpush1.bf16.msra.mxu0 %v1035_v4  ;;  %1014 = vmatpush1.bf16.msra.mxu1 %v1035_v4  ;;  %v1071_v19 = vld [vmem:[%s1154_s30 + $0xb4] ss:$8 sps:$4 sm:$0xff]   ;;  %v1049_v20 = vld [vmem:[%s1154_s30 + $0x20] ss:$8 sps:$4 sm:$0xff]   ;;  %v1073_v21 = vld [vmem:[%s1154_s30 + $0xb0] ss:$8 sps:$4 sm:$0xff]  }
  0x14   : > { %539 = vmatprep.subr.bf16.mxu0 %v1097_v1  ;;  %1006 = vmatprep.subr.bf16.mxu1 %v1097_v1  ;;  %v1050_v22 = vld [vmem:[%s1154_s30 + $0x34] ss:$8 sps:$4 sm:$0xff]   ;;  %v1077_v23 = vld [vmem:[%s1154_s30 + $0xc4] ss:$8 sps:$4 sm:$0xff]   ;;  %v1052_v24 = vld [vmem:[%s1154_s30 + $0x30] ss:$8 sps:$4 sm:$0xff]  }
  0x15   : > { %v1079_v25 = vld [vmem:[%s1154_s30 + $0xc0] ss:$8 sps:$4 sm:$0xff]   ;;  %v1053_v26 = vld [vmem:[%s1154_s30 + $0x44] ss:$8 sps:$4 sm:$0xff]   ;;  %v1080_v27 = vld [vmem:[%s1154_s30 + $0xd4] ss:$8 sps:$4 sm:$0xff]  }
  0x16   : > { %v1055_v28 = vld [vmem:[%s1154_s30 + $0x40] ss:$8 sps:$4 sm:$0xff]   ;;  %v1082_v29 = vld [vmem:[%s1154_s30 + $0xd0] ss:$8 sps:$4 sm:$0xff]   ;;  %v1056_v30 = vld [vmem:[%s1154_s30 + $0x54] ss:$8 sps:$4 sm:$0xff]  }
  0x17   : > { %540 = vmatpush1.bf16.msra.mxu0 %v1036_v6  ;;  %1015 = vmatpush1.bf16.msra.mxu1 %v1036_v6  ;;  %v1083_v31 = vld [vmem:[%s1154_s30 + $0xe4] ss:$8 sps:$4 sm:$0xff]   ;;  %v1058_v32 = vld [vmem:[%s1154_s30 + $0x50] ss:$8 sps:$4 sm:$0xff]   ;;  %v1085_v33 = vld [vmem:[%s1154_s30 + $0xe0] ss:$8 sps:$4 sm:$0xff]  }
  0x18   : > { %541 = vmatprep.subr.bf16.mxu0 %v1097_v1  ;;  %1007 = vmatprep.subr.bf16.mxu1 %v1097_v1  ;;  %v1062_v34 = vld [vmem:[%s1154_s30 + $0x64] ss:$8 sps:$4 sm:$0xff]   ;;  %v1086_v35 = vld [vmem:[%s1154_s30 + $0xf4] ss:$8 sps:$4 sm:$0xff]   ;;  %v1064_v36 = vld [vmem:[%s1154_s30 + $0x60] ss:$8 sps:$4 sm:$0xff]  }
  0x19   : > { %v1088_v37 = vld [vmem:[%s1154_s30 + $0xf0] ss:$8 sps:$4 sm:$0xff]   ;;  %v1068_v38 = vld [vmem:[%s1154_s30 + $0x74] ss:$8 sps:$4 sm:$0xff]   ;;  %v1074_v40 = vld [vmem:[%s1154_s30 + $0x84] ss:$8 sps:$4 sm:$0xff]  }
  0x1a   : > { %v1070_v39 = vld [vmem:[%s1154_s30 + $0x70] ss:$8 sps:$4 sm:$0xff]   ;;  %v1076_v41 = vld [vmem:[%s1154_s30 + $0x80] ss:$8 sps:$4 sm:$0xff]   ;;  %s225_s30 = scalar_lea.vmem %s1356_s5, %s1360_s19 }
  0x1b   : > { %542 = vmatpush1.bf16.msra.mxu0 %v1037_v7  ;;  %1016 = vmatpush1.bf16.msra.mxu1 %v1037_v7 }
  0x1c   : > { %543 = vmatprep.subr.bf16.mxu0 %v1097_v1  ;;  %1008 = vmatprep.subr.bf16.mxu1 %v1097_v1 }
  0x1f   : > { %544 = vmatpush1.bf16.msra.mxu0 %v1038_v9  ;;  %1017 = vmatpush1.bf16.msra.mxu1 %v1038_v9 }
  0x20   : > { %545 = vmatprep.subr.bf16.mxu0 %v1097_v1  ;;  %1009 = vmatprep.subr.bf16.mxu1 %v1097_v1 }
  0x23   : > { %546 = vmatpush1.bf16.msra.mxu0 %v1039_v10  ;;  %1018 = vmatpush1.bf16.msra.mxu1 %v1039_v10 }
  0x24   : > { %547 = vmatprep.subr.bf16.mxu0 %v1097_v1  ;;  %1010 = vmatprep.subr.bf16.mxu1 %v1097_v1 }
  0x27   : > { %548 = vmatpush1.bf16.msra.mxu0 %v1040_v11  ;;  %1019 = vmatpush1.bf16.msra.mxu1 %v1040_v11 }
  0x28   : > { %999 = vmatprep.subr.bf16.mxu1 %v1098_v44 }
  0x2a   : > { %564 = vmatmul.mubr.bf16.vlgmr.msra.gmra.mrb[0].mxu0 %v1041_v12  ;;  %636 = vmatmul.mubr.bf16.vlgmr.msra.gmra.mrb[0].mxu1 %v1059_v13 }
  0x2b   : > { %970 = vmatprep.mubr.msk.bf16.mxu0 %vm482_vm0, %v1044_v14  ;;  %979 = vmatprep.mubr.msk.bf16.mxu1 %vm482_vm0, %v1065_v15 }
  0x2c   : > { %1001 = vmatpush3.bf16.msra.mxu1 %v1000_v45 }
  0x32   : > { %572 = vmatmul.mubr.bf16.gmra.mrb[4].mxu0 %v1046_v16  ;;  %644 = vmatmul.mubr.bf16.gmra.mrb[4].mxu1 %v1067_v17 }
  0x33   : > { %971 = vmatprep.mubr.msk.bf16.mxu0 %vm482_vm0, %v1047_v18  ;;  %980 = vmatprep.mubr.msk.bf16.mxu1 %vm482_vm0, %v1071_v19 }
  0x3a   : > { %580 = vmatmul.mubr.bf16.gmra.mrb[8].mxu0 %v1049_v20  ;;  %652 = vmatmul.mubr.bf16.gmra.mrb[8].mxu1 %v1073_v21 }
  0x3b   : > { %972 = vmatprep.mubr.msk.bf16.mxu0 %vm482_vm0, %v1050_v22  ;;  %981 = vmatprep.mubr.msk.bf16.mxu1 %vm482_vm0, %v1077_v23 }
  0x42   : > { %588 = vmatmul.mubr.bf16.gmra.mrb[12].mxu0 %v1052_v24  ;;  %660 = vmatmul.mubr.bf16.gmra.mrb[12].mxu1 %v1079_v25 }
  0x43   : > { %973 = vmatprep.mubr.msk.bf16.mxu0 %vm482_vm0, %v1053_v26  ;;  %982 = vmatprep.mubr.msk.bf16.mxu1 %vm482_vm0, %v1080_v27 }
  0x4a   : > { %596 = vmatmul.mubr.bf16.gmra.mrb[16].mxu0 %v1055_v28  ;;  %668 = vmatmul.mubr.bf16.gmra.mrb[16].mxu1 %v1082_v29 }
  0x4b   : > { %974 = vmatprep.mubr.msk.bf16.mxu0 %vm482_vm0, %v1056_v30  ;;  %983 = vmatprep.mubr.msk.bf16.mxu1 %vm482_vm0, %v1083_v31 }
  0x52   : > { %604 = vmatmul.mubr.bf16.gmra.mrb[20].mxu0 %v1058_v32  ;;  %676 = vmatmul.mubr.bf16.gmra.mrb[20].mxu1 %v1085_v33 }
  0x53   : > { %975 = vmatprep.mubr.msk.bf16.mxu0 %vm482_vm0, %v1062_v34  ;;  %984 = vmatprep.mubr.msk.bf16.mxu1 %vm482_vm0, %v1086_v35 }
  0x5a   : > { %612 = vmatmul.mubr.bf16.gmra.mrb[24].mxu0 %v1064_v36  ;;  %684 = vmatmul.mubr.bf16.gmra.mrb[24].mxu1 %v1088_v37 }
  0x5b   : > { %976 = vmatprep.mubr.msk.bf16.mxu0 %vm482_vm0, %v1068_v38  ;;  %996 = vmatprep.mubr.msk.f32.mxu1 %vm1099_vm1, %v1100_v46 }
  0x62   : > { %620 = vmatmul.mubr.bf16.gmra.mrb[28].mxu0 %v1070_v39 }
  0x63   : > { %977 = vmatprep.mubr.msk.bf16.mxu0 %vm482_vm0, %v1074_v40 }
  0x6a   : > { %628 = vmatmul.mubr.bf16.gmra.mrb[32].mxu0 %v1076_v41 }
  0xfd   : > { %v565_v48 = vpop.f32.mrb[0].mxu0  ;;  %v1233_v49 = vpop.f32.mrb[0].mxu1 }
  0xfe   : > { %v566_v50 = vadd.f32 %v1231_v47, %v565_v48  ;;  %v567_v51 = vpop.f32.mrb[1].mxu0  ;;  %v639_v52 = vpop.f32.mrb[1].mxu1 }
  0xff   : > { %v568_v53 = vpop.f32.mrb[2].mxu0  ;;  %v1236_v54 = vpop.f32.mrb[2].mxu1 }
 0x100   : > { %v692_v55 = vmax.f32 %v566_v50, 0.0  ;;  %v569_v56 = vadd.f32 %v1231_v47, %v568_v53  ;;  %v570_v57 = vpop.f32.mrb[3].mxu0  ;;  %v642_v58 = vpop.f32.mrb[3].mxu1 }
 0x102   : > { %v693_v59 = vmax.f32 %v569_v56, 0.0  ;;  %v724_v60 = vsel %vm482_vm0, %v692_v55, 0.0 }
 0x104   : > { %v725_v61 = vsel %vm482_vm0, %v693_v59, 0.0 }
 0x105   : > { %v726_v62 = vadd.f32 %v725_v61, %v724_v60  ;;  %v573_v63 = vpop.f32.mrb[4].mxu0  ;;  %v1241_v0 = vpop.f32.mrb[4].mxu1 }
 0x106   : > { %v574_v1 = vadd.f32 %v1231_v47, %v573_v63  ;;  %v575_v2 = vpop.f32.mrb[5].mxu0  ;;  %v647_v3 = vpop.f32.mrb[5].mxu1 }
 0x107   : > { %v576_v4 = vpop.f32.mrb[6].mxu0  ;;  %v1244_v5 = vpop.f32.mrb[6].mxu1 }
 0x108   : > { %v694_v6 = vmax.f32 %v574_v1, 0.0  ;;  %v577_v7 = vadd.f32 %v1231_v47, %v576_v4  ;;  %v578_v8 = vpop.f32.mrb[7].mxu0  ;;  %v650_v9 = vpop.f32.mrb[7].mxu1 }
 0x10a   : > { %v727_v10 = vsel %vm482_vm0, %v694_v6, 0.0  ;;  %v695_v11 = vmax.f32 %v577_v7, 0.0 }
 0x10b   : > { %v728_v12 = vadd.f32 %v727_v10, %v726_v62 }
 0x10c   : > { %v729_v13 = vsel %vm482_vm0, %v695_v11, 0.0 }
 0x10d   : > { %v730_v14 = vadd.f32 %v729_v13, %v728_v12  ;;  %v581_v15 = vpop.f32.mrb[8].mxu0  ;;  %v1249_v16 = vpop.f32.mrb[8].mxu1 }
 0x10e   : > { %v582_v17 = vadd.f32 %v1231_v47, %v581_v15  ;;  %v583_v18 = vpop.f32.mrb[9].mxu0  ;;  %v655_v19 = vpop.f32.mrb[9].mxu1 }
 0x10f   : > { %v584_v20 = vpop.f32.mrb[10].mxu0  ;;  %v1252_v21 = vpop.f32.mrb[10].mxu1 }
 0x110   : > { %v696_v22 = vmax.f32 %v582_v17, 0.0  ;;  %v585_v23 = vadd.f32 %v1231_v47, %v584_v20  ;;  %v586_v24 = vpop.f32.mrb[11].mxu0  ;;  %v658_v25 = vpop.f32.mrb[11].mxu1 }
 0x112   : > { %v731_v26 = vsel %vm482_vm0, %v696_v22, 0.0  ;;  %v697_v27 = vmax.f32 %v585_v23, 0.0 }
 0x113   : > { %v732_v28 = vadd.f32 %v731_v26, %v730_v14 }
 0x114   : > { %v733_v29 = vsel %vm482_vm0, %v697_v27, 0.0 }
 0x115   : > { %v734_v30 = vadd.f32 %v733_v29, %v732_v28  ;;  %v589_v31 = vpop.f32.mrb[12].mxu0  ;;  %v1257_v32 = vpop.f32.mrb[12].mxu1 }
 0x116   : > { %v590_v33 = vadd.f32 %v1231_v47, %v589_v31  ;;  %v591_v34 = vpop.f32.mrb[13].mxu0  ;;  %v663_v35 = vpop.f32.mrb[13].mxu1 }
 0x117   : > { %v592_v36 = vpop.f32.mrb[14].mxu0  ;;  %v1260_v37 = vpop.f32.mrb[14].mxu1 }
 0x118   : > { %v698_v38 = vmax.f32 %v590_v33, 0.0  ;;  %v593_v39 = vadd.f32 %v1231_v47, %v592_v36  ;;  %v594_v40 = vpop.f32.mrb[15].mxu0  ;;  %v666_v41 = vpop.f32.mrb[15].mxu1 }
 0x11a   : > { %v735_v42 = vsel %vm482_vm0, %v698_v38, 0.0  ;;  %v699_v43 = vmax.f32 %v593_v39, 0.0 }
 0x11b   : > { %v736_v44 = vadd.f32 %v735_v42, %v734_v30 }
 0x11c   : > { %v737_v45 = vsel %vm482_vm0, %v699_v43, 0.0 }
 0x11d   : > { %v738_v46 = vadd.f32 %v737_v45, %v736_v44  ;;  %v597_v48 = vpop.f32.mrb[16].mxu0  ;;  %v1265_v50 = vpop.f32.mrb[16].mxu1 }
 0x11e   : > { %v598_v51 = vadd.f32 %v1231_v47, %v597_v48  ;;  %v599_v52 = vpop.f32.mrb[17].mxu0  ;;  %v671_v53 = vpop.f32.mrb[17].mxu1 }
 0x11f   : > { %v600_v55 = vpop.f32.mrb[18].mxu0  ;;  %v1268_v56 = vpop.f32.mrb[18].mxu1 }
 0x120   : > { %v700_v57 = vmax.f32 %v598_v51, 0.0  ;;  %v601_v58 = vadd.f32 %v1231_v47, %v600_v55  ;;  %v602_v59 = vpop.f32.mrb[19].mxu0  ;;  %v674_v60 = vpop.f32.mrb[19].mxu1 }
 0x122   : > { %v739_v61 = vsel %vm482_vm0, %v700_v57, 0.0  ;;  %v701_v62 = vmax.f32 %v601_v58, 0.0  ;;  %v638_v58 = vadd.f32 %v1231_v47, %v1233_v49 }
 0x123   : > { %v740_v63 = vadd.f32 %v739_v61, %v738_v46 }
 0x124   : > { %v741_v1 = vsel %vm482_vm0, %v701_v62, 0.0  ;;  %v641_v62 = vadd.f32 %v1231_v47, %v1236_v54 }
 0x125   : > { %v742_v2 = vadd.f32 %v741_v1, %v740_v63  ;;  %v605_v3 = vpop.f32.mrb[20].mxu0  ;;  %v1273_v4 = vpop.f32.mrb[20].mxu1 }
 0x126   : > { %v606_v6 = vadd.f32 %v1231_v47, %v605_v3  ;;  %v607_v7 = vpop.f32.mrb[21].mxu0  ;;  %v679_v8 = vpop.f32.mrb[21].mxu1  ;;  %v710_v3 = vmax.f32 %v638_v58, 0.0  ;;  %v711_v49 = vmax.f32 %v641_v62, 0.0 }
 0x127   : > { %v608_v9 = vpop.f32.mrb[22].mxu0  ;;  %v1276_v10 = vpop.f32.mrb[22].mxu1 }
 0x128   : > { %v702_v11 = vmax.f32 %v606_v6, 0.0  ;;  %v609_v12 = vadd.f32 %v1231_v47, %v608_v9  ;;  %v610_v13 = vpop.f32.mrb[23].mxu0  ;;  %v682_v14 = vpop.f32.mrb[23].mxu1  ;;  %v646_v6 = vadd.f32 %v1231_v47, %v1241_v0  ;;  %v759_v54 = vsel %vm482_vm0, %v710_v3, 0.0 }
 0x129   : > { %v761_v0 = vsel %vm482_vm0, %v711_v49, 0.0 }
 0x12a   : > { %v743_v15 = vsel %vm482_vm0, %v702_v11, 0.0  ;;  %v703_v17 = vmax.f32 %v609_v12, 0.0  ;;  %v649_v11 = vadd.f32 %v1231_v47, %v1244_v5  ;;  %v712_v14 = vmax.f32 %v646_v6, 0.0 }
 0x12b   : > { %v744_v18 = vadd.f32 %v743_v15, %v742_v2  ;;  %v654_v15 = vadd.f32 %v1231_v47, %v1249_v16  ;;  %v665_v16 = vadd.f32 %v1231_v47, %v1260_v37  ;;  %v678_v37 = vadd.f32 %v1231_v47, %v1273_v4 }
 0x12c   : > { %v745_v19 = vsel %vm482_vm0, %v703_v17, 0.0 }
 0x12d   : > { %v746_v20 = vadd.f32 %v745_v19, %v744_v18  ;;  %v613_v22 = vpop.f32.mrb[24].mxu0  ;;  %v1281_v23 = vpop.f32.mrb[24].mxu1  ;;  %v713_v18 = vmax.f32 %v649_v11, 0.0  ;;  %v657_v19 = vadd.f32 %v1231_v47, %v1252_v21  ;;  %v714_v5 = vmax.f32 %v654_v15, 0.0 }
 0x12e   : > { %v614_v24 = vadd.f32 %v1231_v47, %v613_v22  ;;  %v615_v25 = vpop.f32.mrb[25].mxu0  ;;  %v687_v26 = vpop.f32.mrb[25].mxu1  ;;  %v763_v22 = vsel %vm482_vm0, %v712_v14, 0.0  ;;  %v670_v21 = vadd.f32 %v1231_v47, %v1265_v50  ;;  %v681_v50 = vadd.f32 %v1231_v47, %v1276_v10 }
 0x12f   : > { %v616_v27 = vpop.f32.mrb[26].mxu0  ;;  %v1284_v28 = vpop.f32.mrb[26].mxu1  ;;  %v765_v26 = vsel %vm482_vm0, %v713_v18, 0.0 }
 0x130   : > { %v704_v29 = vmax.f32 %v614_v24, 0.0  ;;  %v617_v30 = vadd.f32 %v1231_v47, %v616_v27  ;;  %v618_v31 = vpop.f32.mrb[27].mxu0  ;;  %v690_v33 = vpop.f32.mrb[27].mxu1  ;;  %v662_v24 = vadd.f32 %v1231_v47, %v1257_v32  ;;  %v715_v27 = vmax.f32 %v657_v19, 0.0 }
 0x131   : > { %v673_v32 = vadd.f32 %v1231_v47, %v1268_v56  ;;  %v689_v4 = vadd.f32 %v1231_v47, %v1284_v28 }
 0x132   : > { %v747_v34 = vsel %vm482_vm0, %v704_v29, 0.0  ;;  %v705_v35 = vmax.f32 %v617_v30, 0.0  ;;  %v767_v30 = vsel %vm482_vm0, %v714_v5, 0.0  ;;  %v716_v31 = vmax.f32 %v662_v24, 0.0 }
 0x133   : > { %v748_v36 = vadd.f32 %v747_v34, %v746_v20  ;;  %v769_v34 = vsel %vm482_vm0, %v715_v27, 0.0  ;;  %v723_v58 = vmax.f32 %v689_v4, 0.0 }
 0x134   : > { %v749_v38 = vsel %vm482_vm0, %v705_v35, 0.0  ;;  %v717_v35 = vmax.f32 %v665_v16, 0.0 }
 0x135   : > { %v750_v39 = vadd.f32 %v749_v38, %v748_v36  ;;  %v621_v40 = vpop.f32.mrb[28].mxu0  ;;  %v771_v38 = vsel %vm482_vm0, %v716_v31, 0.0 }
 0x136   : > { %v622_v41 = vadd.f32 %v1231_v47, %v621_v40  ;;  %v623_v42 = vpop.f32.mrb[29].mxu0 }
 0x137   : > { %v624_v43 = vpop.f32.mrb[30].mxu0  ;;  %v719_v42 = vmax.f32 %v673_v32, 0.0 }
 0x138   : > { %v706_v44 = vmax.f32 %v622_v41, 0.0  ;;  %v625_v45 = vadd.f32 %v1231_v47, %v624_v43  ;;  %v626_v46 = vpop.f32.mrb[31].mxu0  ;;  %v773_v41 = vsel %vm482_vm0, %v717_v35, 0.0  ;;  %v686_v43 = vadd.f32 %v1231_v47, %v1281_v23 }
 0x13a   : > { %v751_v48 = vsel %vm482_vm0, %v706_v44, 0.0  ;;  %v707_v51 = vmax.f32 %v625_v45, 0.0  ;;  %v720_v45 = vmax.f32 %v678_v37, 0.0 }
 0x13b   : > { %v752_v52 = vadd.f32 %v751_v48, %v750_v39  ;;  %v718_v39 = vmax.f32 %v670_v21, 0.0  ;;  %v777_v48 = vsel %vm482_vm0, %v719_v42, 0.0 }
 0x13c   : > { %v753_v53 = vsel %vm482_vm0, %v707_v51, 0.0  ;;  %v721_v51 = vmax.f32 %v681_v50, 0.0 }
 0x13d   : > { %v754_v55 = vadd.f32 %v753_v53, %v752_v52  ;;  %v629_v57 = vpop.f32.mrb[32].mxu0  ;;  %v775_v56 = vsel %vm482_vm0, %v718_v39, 0.0  ;;  %v722_v52 = vmax.f32 %v686_v43, 0.0 }
 0x13e   : > { %v630_v59 = vadd.f32 %v1231_v47, %v629_v57  ;;  %v631_v60 = vpop.f32.mrb[33].mxu0  ;;  %v781_v10 = vsel %vm482_vm0, %v721_v51, 0.0 }
 0x13f   : > { %v632_v61 = vpop.f32.mrb[34].mxu0  ;;  %v783_v23 = vsel %vm482_vm0, %v722_v52, 0.0 }
 0x140   : > { %v708_v63 = vmax.f32 %v630_v59, 0.0  ;;  %v633_v1 = vadd.f32 %v1231_v47, %v632_v61  ;;  %v634_v2 = vpop.f32.mrb[35].mxu0  ;;  %v785_v61 = vsel %vm482_vm0, %v723_v58, 0.0 }
 0x142   : > { %v755_v7 = vsel %vm482_vm0, %v708_v63, 0.0  ;;  %v709_v8 = vmax.f32 %v633_v1, 0.0 }
 0x143   : > { %v756_v9 = vadd.f32 %v755_v7, %v754_v55  ;;  %v779_v55 = vsel %vm482_vm0, %v720_v45, 0.0  ;;  %v796_v7 = vld [vmem:[%s1355_s4] sm:$0x1] }
 0x144   : > { %v757_v12 = vsel %vm482_vm0, %v709_v8, 0.0 }
 0x145   : > { %v758_v13 = vadd.f32 %v757_v12, %v756_v9 }
 0x147   : > { %v760_v17 = vadd.f32 %v759_v54, %v758_v13 }
 0x149   : > { %v762_v20 = vadd.f32 %v761_v0, %v760_v17 }
 0x14b   : > { %v764_v25 = vadd.f32 %v763_v22, %v762_v20 }
 0x14d   : > { %v766_v29 = vadd.f32 %v765_v26, %v764_v25 }
 0x14f   : > { %v768_v33 = vadd.f32 %v767_v30, %v766_v29 }
 0x151   : > { %v770_v36 = vadd.f32 %v769_v34, %v768_v33 }
 0x153   : > { %v772_v40 = vadd.f32 %v771_v38, %v770_v36 }
 0x155   : > { %v774_v44 = vadd.f32 %v773_v41, %v772_v40 }
 0x157   : > { %v776_v46 = vadd.f32 %v775_v56, %v774_v44 }
 0x159   : > { %v778_v53 = vadd.f32 %v777_v48, %v776_v46 }
 0x15b   : > { %v780_v57 = vadd.f32 %v779_v55, %v778_v53 }
 0x15d   : > { %v782_v59 = vadd.f32 %v781_v10, %v780_v57 }
 0x15f   : > { %v784_v60 = vadd.f32 %v783_v23, %v782_v59 }
 0x161   : > { %v786_v62 = vadd.f32 %v785_v61, %v784_v60 }
 0x163   : > { %v787_v63 = vrot.slane %v786_v62, 4 }
 0x165   : > { %v788_v1 = vadd.f32 %v787_v63, %v786_v62 }
 0x167   : > { %v789_v2 = vrot.slane %v788_v1, 2 }
 0x169   : > { %v790_v47 = vadd.f32 %v789_v2, %v788_v1 }
 0x16b   : > { %v791_v28 = vrot.slane %v790_v47, 1 }
 0x16d   : > { %v792_v3 = vadd.f32 %v791_v28, %v790_v47 }
 0x16f   : > { %v793_v6 = vmul.f32 0.00390625, %v792_v3 }
 0x171   : > { %997 = vmatmul.mubr.msk.f32.vlgmr.msra.gmra.mrb[28].mxu1 %vm482_vm0, %v793_v6 }
 0x244   : > { %v866_v8 = vpop.f32.mrb[28].mxu1 }
 0x245   : > { %v867_v9 = vadd.f32 %v866_v8, %v796_v7  ;;  %v998_v49 = vpop.f32.mrb[29].mxu1 }
 0x247   : > { %871 = vst.msk [vmem:[%s225_s30] sm:$0x1] %vm870_vm2, %v867_v9 }
 0x248 PF: > { %s15_s18 = sadd.s32 1, %s1095_s18  }
 0x249   : > { %p12_p5 = scmp.ge.s32.totalorder %s15_s18, 10  }
 0x24b   :  { %14 = sbr.rel (!%p12_p5) target bundleno = 1 (0x1), region = 70 }

// kernel: unique_eq2_net_forward.5
= control target key start
LH: loop header
LB: loop body
LE: loop exit
PB: predicated region body
PF: predicated region fallthrough
CT: control target
= control target key end

     0   :  { %s1201_s11 = smov 0   ;;  %s1313_s0 = inlined_call_operand.vmem [shape: f32[2,4,16], index: 0, kind: input, shape index: {}]   ;;  %s1314_s1 = inlined_call_operand.vmem [shape: f32[16,48], index: 1, kind: input, shape index: {}]   ;;  %s1315_s2 = inlined_call_operand.vmem [shape: f32[16,48], index: 2, kind: input, shape index: {}]   ;;  %s1316_s3 = inlined_call_operand.vmem [shape: f32[16,32], index: 3, kind: input, shape index: {}]   ;;  %s1317_s4 = inlined_call_operand.vmem [shape: f32[16,32], index: 4, kind: input, shape index: {}]   ;;  %s1318_s5 = inlined_call_operand.vmem [shape: f32[16,16], index: 5, kind: input, shape index: {}]   ;;  %s1319_s6 = inlined_call_operand.vmem [shape: f32[1,16], index: 6, kind: input, shape index: {}]   ;;  %s1320_s7 = inlined_call_operand.vmem [shape: f32[1,16], index: 7, kind: input, shape index: {}]   ;;  %s1321_s8 = inlined_call_operand.<no memory space> [shape: f32[1,1], index: 8, kind: input, shape index: {}]   ;;  %s1322_s9 = inlined_call_operand.vmem [shape: f32[2,1,1], index: 9, kind: output, shape index: {}]  }
   0x1   :  { %v14_v0 = vstv %s1321_s8 }
   0x2   :  { %15 = vst [vmem:[#allocation2] sm:$0x1] %v14_v0 }
   0x3 LB: > { %s1031_s12 = sadd.s32 4294967295, %s1139_s11   ;;  %p1035_p0 = scmp.ge.s32.totalorder %s1139_s11, 1  ;;  %s1139_s11 = sphi %s1201_s11, %s21_s11  }
   0x4   : > { %p288_p1 = scmp.lt.s32.totalorder %s1139_s11, 3 }
   0x6   : > { %p289_p2 = pnand %p1035_p0, %p288_p1 }
   0x7   : > { %v349_v1 = vld [vmem:[%s1315_s2] sm:$0xff] (!%p289_p2)  ;;  %v350_v2 = vld [vmem:[%s1315_s2 + $0x8] sm:$0xff] (!%p289_p2)  ;;  %v662_v4 = vlaneseq (!%p289_p2)  ;;  %v1141_v5 = vmov (!%p289_p2), 0.0|0.0   ;;  %p321_p3 = scmp.lt.s32.totalorder (!%p289_p2), %s1031_s12, 1  ;;  %vm1142_vm0 = vmmov (!%p289_p2), 0   ;;  %v1143_v9 = vmov (!%p289_p2), 0.0  }
   0x8   : > { %292 = sbr.rel (%p289_p2) target bundleno = 561 (0x231), region = 56  ;;  %v500_v3 = vld [vmem:[%s1317_s4] sm:$0xff] (!%p289_p2)  ;;  %1098 = vmatprep.subr.bf16.mxu0 (!%p289_p2), %v1141_v5  ;;  %1104 = vmatprep.subr.bf16.mxu1 (!%p289_p2), %v1141_v5  ;;  %v1099_v6 = vpack.c.bf16 (!%p289_p2), %v350_v2, %v349_v1  ;;  %v501_v7 = vld [vmem:[%s1317_s4 + $0x8] sm:$0xff] (!%p289_p2)  ;;  %s1144_s22 = smov (!%p289_p2), 16   ;;  %v1145_v13 = vmov (!%p289_p2), 1966171168  }
   0x9   : > { %v1105_v8 = vpack.c.bf16 (!%p289_p2), %v501_v7, %v500_v3  ;;  %1067 = vmatprep.mubr.msk.f32.mxu0 (!%p289_p2), %vm1142_vm0, %v1143_v9  ;;  %1081 = vmatprep.mubr.msk.f32.mxu1 (!%p289_p2), %vm1142_vm0, %v1143_v9  ;;  %v1041_v10 = vld [vmem:[%s1319_s6] ss:$0 sm:$0xff] (!%p289_p2)  ;;  %v1228_v11 = vshrl.u32 (!%p289_p2), %v662_v4, 7  ;;  %v879_v12 = vand.u32 (!%p289_p2), 127, %v662_v4  ;;  %v660_v14 = vunpack.c.l.s4 (!%p289_p2), %v1145_v13  ;;  %v348_v39 = vld [vmem:[%s1314_s1 + $0x8] sm:$0xff] (!%p289_p2)  ;;  %s1146_s19 = smov (!%p289_p2), 96  }
   0xa   : > { %1100 = vmatpush3.bf16.msra.mxu0 (!%p289_p2), %v1099_v6  ;;  %654 = vrot.lane.b32.xlu0 (!%p289_p2), %v1041_v10, %s1144_s22  ;;  %vm329_vm1 = vcmask (!%p289_p2), 125952   ;;  %v347_v37 = vld [vmem:[%s1314_s1] sm:$0xff] (!%p289_p2)  ;;  %v499_v41 = vld [vmem:[%s1316_s3 + $0x8] sm:$0xff] (!%p289_p2)  ;;  %vm351_vm3 = vcmask (!%p289_p2), 130048   ;;  %s1147_s20 = smov (!%p289_p2), 112   ;;  %vm976_vm4 = vcmask (!%p289_p2), 122880  }
   0xb   : > { %1106 = vmatpush3.bf16.msra.mxu1 (!%p289_p2), %v1105_v8  ;;  %1101 = vmatprep.subr.bf16.mxu0 (!%p289_p2), %v1141_v5  ;;  %v1233_v15 = vsub.s32 (!%p289_p2), 0, %v1228_v11  ;;  %v892_v16 = vsub.s32 (!%p289_p2), 1, %v1228_v11  ;;  %vm880_vm2 = vcmp.eq.s32.totalorder (!%p289_p2), %v1228_v11, %v879_v12  ;;  %v661_v17 = vunpack.c.0.s8 (!%p289_p2), %v660_v14  ;;  %v498_v40 = vld [vmem:[%s1316_s3] sm:$0xff] (!%p289_p2)  ;;  %v708_v45 = vld [vmem:[%s1318_s5 + $0x8] sm:$0xff] (!%p289_p2) }
   0xc   : > { %1107 = vmatprep.subr.bf16.mxu1 (!%p289_p2), %v1141_v5  ;;  %v1242_v18 = vsel (!%p289_p2), %vm880_vm2, 1.0, %v1143_v9  ;;  %v707_v44 = vld [vmem:[%s1318_s5] sm:$0xff] (!%p289_p2)  ;;  %v1102_v48 = vpack.c.bf16 (!%p289_p2), %v348_v39, %v347_v37  ;;  %v1108_v49 = vpack.c.bf16 (!%p289_p2), %v499_v41, %v498_v40  ;;  %vm982_vm5 = vcmask (!%p289_p2), 0  }
   0xd   : > { %v886_v20 = vrot.slane (!%p289_p2), %v1242_v18, %v1233_v15  ;;  %v893_v21 = vrot.slane (!%p289_p2), %v1242_v18, %v892_v16  ;;  %v1248_v24 = vsub.s32 (!%p289_p2), %v661_v17, %v1228_v11  ;;  %v1110_v54 = vpack.c.bf16 (!%p289_p2), %v708_v45, %v707_v44 }
   0xf   : > { %s1324_s12 = smov (!%p321_p3, %s1031_s12), 1  ;;  %888 = vbcast.lane.b32.xlu1 %v886_v20, 256  ;;  %895 = vbcast.lane.b32.xlu0 %v893_v21, 256 }
  0x10   : > { %s1036_s23 = sshll.u32 %s1324_s12, 2  ;;  %s327_s25 = scalar_lea.vmem %s1322_s9, %s1324_s12 }
  0x11   : > { %s324_s26 = scalar_lea.vmem %s1313_s0, %s1036_s23 }
  0x12   : > { %v328_v19 = vld [vmem:[%s324_s26] sm:$0xf] }
  0x13   : > { %v330_v22 = vsel %vm329_vm1, %v328_v19, 0.0  ;;  %v337_v23 = vmul.f32 %v328_v19, %v328_v19  ;;  %v665_v27 = vrot.slane %v328_v19, %v1248_v24 }
  0x14   : > { %v331_v25 = vrot.slane %v330_v22, 4 }
  0x15   : > { %v339_v26 = vsel %vm329_vm1, %v337_v23, 0.0  ;;  %v666_v30 = vcombine.high %v665_v27, %v665_v27  ;;  %v673_v35 = vrot.slane %v665_v27, %v1248_v24 }
  0x16   : > { %v332_v28 = vadd.f32 %v331_v25, %v330_v22  ;;  %v340_v29 = vrot.slane %v339_v26, 4  ;;  %v899_v25 = vsub.s32 2, %v1228_v11 }
  0x17   : > { %v680_v36 = vrot.slane %v666_v30, %v1248_v24  ;;  %v681_v46 = vcombine.high %v673_v35, %v673_v35  ;;  %v686_v50 = vrot.slane %v673_v35, %v1233_v15 }
  0x18   : > { %v333_v31 = vrot.slane %v332_v28, 2  ;;  %v341_v32 = vadd.f32 %v340_v29, %v339_v26  ;;  %v906_v26 = vsub.s32 3, %v1228_v11  ;;  %v900_v29 = vrot.slane %v1242_v18, %v899_v25 }
  0x19   : > { %v682_v47 = vcombine.high %v680_v36, %v680_v36  ;;  %v690_v51 = vrot.slane %v680_v36, %v1233_v15  ;;  %v694_v56 = vrot.slane %v681_v46, %v1233_v15  ;;  %v703_v58 = vmul.f32 %v686_v50, %v328_v19 }
  0x1a   : > { %v334_v33 = vadd.f32 %v333_v31, %v332_v28  ;;  %v342_v34 = vrot.slane %v341_v32, 2  ;;  %v907_v30 = vrot.slane %v1242_v18, %v906_v26 }
  0x1b   : > { %v698_v57 = vrot.slane %v682_v47, %v1233_v15  ;;  %v704_v59 = vmul.f32 %v690_v51, %v328_v19  ;;  %v705_v61 = vmul.f32 %v694_v56, %v328_v19 }
  0x1c   : > { %v335_v38 = vrot.slane %v334_v33, 1  ;;  %v343_v43 = vadd.f32 %v342_v34, %v341_v32 }
  0x1d   : > { %v706_v62 = vmul.f32 %v698_v57, %v328_v19  ;;  %v713_v63 = vcombine.low %v703_v58, %v704_v59 }
  0x1e   : > { %v336_v42 = vadd.f32 %v335_v38, %v334_v33  ;;  %v344_v55 = vrot.slane %v343_v43, 1 }
  0x1f   : > { %v714_v0 = vcombine.low %v705_v61, %v706_v62 }
  0x20   : > { %v338_v52 = vmul.f32 %v336_v42, %v328_v19  ;;  %v346_v53 = vmul.f32 %v336_v42, %v336_v42  ;;  %v345_v60 = vadd.f32 %v344_v55, %v343_v43 }
  0x22   : > { %1068 = vmatmul.mubr.msk.f32.vlgmr.msra.gmra.mrb[0].mxu0 %vm351_vm3, %v338_v52  ;;  %1082 = vmatmul.mubr.msk.f32.vlgmr.msra.gmra.mrb[0].mxu1 %vm351_vm3, %v346_v53 }
  0x23   : > { %1103 = vmatpush3.bf16.msra.mxu0 %v1102_v48  ;;  %1109 = vmatpush3.bf16.msra.mxu1 %v1108_v49 }
  0x24   : > { %1074 = vmatprep.mubr.msk.f32.mxu0 %vm1142_vm0, %v1143_v9  ;;  %1088 = vmatprep.mubr.msk.f32.mxu1 %vm1142_vm0, %v1143_v9 }
  0x25   : > { %1111 = vmatprep.subr.bf16.mxu0 %v1110_v54 }
  0x2a   : > { %1075 = vmatmul.mubr.msk.f32.vlgmr.msra.gmra.mrb[0].mxu0 %vm351_vm3, %v337_v23  ;;  %1089 = vmatmul.mubr.msk.f32.vlgmr.msra.gmra.mrb[0].mxu1 %vm351_vm3, %v345_v60 }
  0x2b   : > { %1113 = vmatpush3.bf16.msra.mxu0 %v1110_v54  ;;  %1095 = vmatprep.mubr.msk.f32.mxu0 %vm351_vm3, %v713_v63 }
  0x2e   : > { %1096 = vmatmul.mubr.msk.f32.vlgmr.msra.gmra.mrb[2].mxu0 %vm351_vm3, %v714_v0 }
  0x7c   : > { %v655_v1 = vpop.permute.xlu0 %654 }
  0x81   : > { %v889_v31 = vpop.permute.xlu1 %888  ;;  %v896_v32 = vpop.permute.xlu0 %895 }
  0xfd   : > { %v494_v2 = vpop.f32.mrb[0].mxu0  ;;  %v644_v3 = vpop.f32.mrb[0].mxu1 }
  0xfe   : > { %v807_v4 = vrot.slane %v494_v2, %v1248_v24  ;;  %v1090_v5 = vpop.f32.mrb[1].mxu1  ;;  %857 = vrot.lane.b32.xlu1 %v494_v2, %s1146_s19  ;;  %v1076_v6 = vpop.f32.mrb[1].mxu0  ;;  %v657_v7 = vadd.f32 %v655_v1, %v644_v3 }
 0x100   : > { %v808_v8 = vcombine.high %v807_v4, %v807_v4  ;;  %v815_v9 = vrot.slane %v807_v4, %v1248_v24  ;;  %v867_v10 = vrot.slane %v657_v7, %v1233_v15 }
 0x101   : > { %v1097_v12 = vpop.f32.mrb[2].mxu0 }
 0x102   : > { %v822_v13 = vrot.slane %v808_v8, %v1248_v24  ;;  %869 = vrot.lane.b32.xlu0 %v867_v10, %s1147_s20  ;;  %v915_v14 = vadd.f32 %v815_v9, %v644_v3  ;;  %v823_v16 = vcombine.high %v815_v9, %v815_v9  ;;  %v785_v17 = vpop.f32.mrb[3].mxu0  ;;  %v828_v19 = vrot.slane %v815_v9, %v1233_v15 }
 0x103   : > { %v796_v35 = vcombine.high %v785_v17, %v785_v17  ;;  %v797_v39 = vcombine.high %v1097_v12, %v1097_v12 }
 0x104   : > { %v832_v20 = vrot.slane %v822_v13, %v1233_v15  ;;  %v916_v21 = vadd.f32 %v822_v13, %v644_v3  ;;  %v824_v22 = vcombine.high %v822_v13, %v822_v13  ;;  %v917_v23 = vadd.f32 %v823_v16, %v644_v3 }
 0x105   : > { %v836_v24 = vrot.slane %v823_v16, %v1233_v15  ;;  %v926_v11 = vrot.slane %v915_v14, %v1233_v15 }
 0x106   : > { %841 = vrot.lane.b32.xlu0 %v828_v19, %s1147_s20  ;;  %843 = vrot.lane.b32.xlu1 %v832_v20, %s1147_s20  ;;  %v918_v27 = vadd.f32 %v824_v22, %v644_v3  ;;  %v840_v28 = vrot.slane %v824_v22, %v1233_v15  ;;  %v930_v36 = vrot.slane %v916_v21, %v1233_v15  ;;  %v974_v19 = vld [vmem:[%s1320_s7] sm:$0x1] }
 0x107   : > { %v943_v44 = vmul.f32 %v926_v11, %v889_v31  ;;  %v934_v51 = vrot.slane %v917_v23, %v1233_v15  ;;  %v980_v23 = vld [vmem:[#allocation2] sm:$0x1] }
 0x108   : > { %v944_v18 = vmul.f32 %v930_v36, %v896_v32  ;;  %v938_v57 = vrot.slane %v918_v27, %v1233_v15 }
 0x10a   : > { %845 = vrot.lane.b32.xlu1 %v836_v24, %s1147_s20  ;;  %847 = vrot.lane.b32.xlu0 %v840_v28, %s1147_s20 }
 0x10e   : > { %902 = vbcast.lane.b32.xlu1 %v900_v29, 256  ;;  %909 = vbcast.lane.b32.xlu0 %v907_v30, 256 }
 0x170   : > { %v858_v33 = vpop.permute.xlu1 %857 }
 0x174   : > { %v870_v34 = vpop.permute.xlu0 %869 }
 0x178   : > { %v842_v37 = vpop.permute.xlu0 %841  ;;  %v844_v38 = vpop.permute.xlu1 %843 }
 0x179   : > { %v853_v40 = vadd.f32 %v842_v37, %v785_v17  ;;  %v854_v41 = vadd.f32 %v844_v38, %v796_v35 }
 0x17b   : > { %v860_v42 = vadd.f32 %v858_v33, %v853_v40  ;;  %v861_v43 = vadd.f32 %v858_v33, %v854_v41 }
 0x17c   : > { %v846_v45 = vpop.permute.xlu1 %845  ;;  %v848_v46 = vpop.permute.xlu0 %847 }
 0x17d   : > { %v872_v47 = vadd.f32 %v870_v34, %v860_v42  ;;  %v873_v48 = vadd.f32 %v870_v34, %v861_v43  ;;  %v855_v49 = vadd.f32 %v1097_v12, %v846_v45  ;;  %v856_v50 = vadd.f32 %v848_v46, %v797_v39 }
 0x17f   : > { %v947_v52 = vadd.f32 %v943_v44, %v872_v47  ;;  %v948_v53 = vadd.f32 %v944_v18, %v873_v48  ;;  %v862_v54 = vadd.f32 %v858_v33, %v855_v49  ;;  %v863_v55 = vadd.f32 %v858_v33, %v856_v50 }
 0x180   : > { %v903_v56 = vpop.permute.xlu1 %902  ;;  %v910_v58 = vpop.permute.xlu0 %909 }
 0x181   : > { %v951_v59 = vmax.f32 %v947_v52, 0.0  ;;  %v952_v60 = vmax.f32 %v948_v53, 0.0  ;;  %v874_v61 = vadd.f32 %v870_v34, %v862_v54  ;;  %v945_v62 = vmul.f32 %v934_v51, %v903_v56 }
 0x182   : > { %v875_v63 = vadd.f32 %v870_v34, %v863_v55  ;;  %v946_v0 = vmul.f32 %v938_v57, %v910_v58 }
 0x183   : > { %v959_v1 = vcombine.low %v951_v59, %v952_v60  ;;  %v949_v2 = vadd.f32 %v945_v62, %v874_v61 }
 0x184   : > { %v950_v3 = vadd.f32 %v946_v0, %v875_v63 }
 0x185   : > { %v953_v4 = vmax.f32 %v949_v2, 0.0  ;;  %v963_v7 = vsel %vm351_vm3, %v959_v1, 0.0 }
 0x186   : > { %v954_v5 = vmax.f32 %v950_v3, 0.0 }
 0x188   : > { %v960_v6 = vcombine.low %v953_v4, %v954_v5 }
 0x18a   : > { %v964_v8 = vsel %vm351_vm3, %v960_v6, 0.0 }
 0x18b   : > { %v965_v9 = vadd.f32 %v964_v8, %v963_v7 }
 0x18d   : > { %v966_v15 = vrot.slane %v965_v9, 4 }
 0x18f   : > { %v967_v10 = vadd.f32 %v966_v15, %v965_v9 }
 0x191   : > { %v968_v12 = vrot.slane %v967_v10, 2 }
 0x193   : > { %v969_v13 = vadd.f32 %v968_v12, %v967_v10 }
 0x195   : > { %v970_v14 = vrot.slane %v969_v13, 1 }
 0x197   : > { %v971_v16 = vadd.f32 %v970_v14, %v969_v13 }
 0x199   : > { %v972_v17 = vmul.f32 0.0625, %v971_v16 }
 0x19b   : > { %v973_v20 = vmax.f32 %v972_v17, 0.0 }
 0x19d   : > { %v975_v21 = vmul.f32 %v974_v19, %v973_v20 }
 0x19f   : > { %v977_v22 = vsel %vm976_vm4, %v975_v21, 0.0 }
 0x1a0   : > { %978 = vadd.xlane.f32.xlu1 %v977_v22 }
 0x22d   : > { %v979_v25 = vpop.xlane.xlu1 %978 }
 0x22e   : > { %v981_v26 = vadd.f32 %v980_v23, %v979_v25 }
 0x230   : > { %983 = vst.msk [vmem:[%s327_s25] sm:$0x1] %vm982_vm5, %v981_v26 }
 0x231 PF: > { %s21_s11 = sadd.s32 1, %s1139_s11  }
 0x232   : > { %p18_p4 = scmp.ge.s32.totalorder %s21_s11, 4  }
 0x234   :  { %20 = sbr.rel (!%p18_p4) target bundleno = 3 (0x3), region = 86 }

</bundles_post_ra>
